<compile_context>
chip_gen: v7x
topology: tpu7x:2x2x1
jax: 0.10.0
libtpu: 0.0.40
codegen_flags: <defaults>
</compile_context>

<pallas_src>
import functools

import jax
import jax.numpy as jnp
import numpy as np
from jax import lax
from jax.experimental import pallas as pl
from jax.experimental.pallas import tpu as pltpu


def _round_up(x, m):
    return (x + m - 1) // m * m


def lstm_block_kernel(x_ref, wih_ref, bias_ref, whh_ref, hn_ref, cn_ref,
                      xproj_ref, *, Tb, Hp, T_total, unroll):
    """One (batch-tile, time-block) grid step of the LSTM.

    x_ref:     (Tb, Bt, Ep)   bf16  embedded inputs for this time block (streamed)
    wih_ref:   (Ep, 4*Hp)     bf16  W_ih^T, gate-padded (resident)
    bias_ref:  (1, 4*Hp)      f32   b_ih + b_hh, gate-padded (resident)
    whh_ref:   (Hp, 4*Hp)     bf16  W_hh^T, gate-padded (resident)
    hn_ref:    (Bt, Hp)       f32   hidden state (resident across time blocks)
    cn_ref:    (Bt, Hp)       f32   cell state   (resident across time blocks)
    xproj_ref: (Tb, Bt, 4*Hp) f32   scratch: block-hoisted input projection
    """
    t_blk = pl.program_id(1)
    Bt = hn_ref.shape[0]
    Ep = x_ref.shape[-1]

    @pl.when(t_blk == 0)
    def _():
        hn_ref[...] = jnp.zeros_like(hn_ref)
        cn_ref[...] = jnp.zeros_like(cn_ref)

    # Block-hoisted input projection: one big MXU matmul per time block
    # (bf16 operands, f32 accumulate), bias folded in.
    x = x_ref[...].reshape(Tb * Bt, Ep)
    proj = jnp.dot(x, wih_ref[...], preferred_element_type=jnp.float32)
    xproj_ref[...] = (proj + bias_ref[...]).reshape(Tb, Bt, 4 * Hp)

    whh = whh_ref[...]                                   # resident bf16 weights

    def step(t, carry):
        h, c = carry
        # Only serial per-step work: one (Bt, Hp) x (Hp, 4*Hp) bf16 MXU matmul.
        gates = xproj_ref[t] + jnp.dot(h.astype(jnp.bfloat16), whh,
                                       preferred_element_type=jnp.float32)
        # Each gate slice is a full, 128-aligned lane group (Hp % 128 == 0).
        i_g = jax.nn.sigmoid(gates[:, 0 * Hp:1 * Hp])
        f_g = jax.nn.sigmoid(gates[:, 1 * Hp:2 * Hp])
        g_g = jnp.tanh(gates[:, 2 * Hp:3 * Hp])
        o_g = jax.nn.sigmoid(gates[:, 3 * Hp:4 * Hp])
        c_new = f_g * c + i_g * g_g
        h_new = o_g * jnp.tanh(c_new)
        if T_total % Tb != 0:
            # Padded trailing timesteps must not advance the state.
            valid = (t_blk * Tb + t) < T_total
            h_new = jnp.where(valid, h_new, h)
            c_new = jnp.where(valid, c_new, c)
        return h_new, c_new

    h, c = lax.fori_loop(0, Tb, step, (hn_ref[...], cn_ref[...]), unroll=unroll)
    hn_ref[...] = h
    cn_ref[...] = c


def _gate_padded_weight_t(w, H, Hp):
    """w: (4H, F) PyTorch-layout weight. Returns (F, 4*Hp) transposed weight where
    gate k's outputs occupy lanes [k*Hp, k*Hp + H); padded lanes are zero."""
    F = w.shape[1]
    wg = w.reshape(4, H, F)                      # (gate, out, in)
    wg = jnp.transpose(wg, (0, 2, 1))            # (gate, in, out)
    wg = jnp.pad(wg, ((0, 0), (0, 0), (0, Hp - H)))
    return jnp.transpose(wg, (1, 0, 2)).reshape(F, 4 * Hp)


@jax.jit
def encoder_rnn_forward(input_tensor, params):
    """input_tensor: (N, seq_len) int32 token ids. Returns (hn, cn), each (1, N, H)."""
    emb = params["embedding"]
    w_ih, w_hh = params["w_ih"], params["w_hh"]
    b = params["b_ih"] + params["b_hh"]

    N, T = input_tensor.shape
    E = emb.shape[1]
    H = w_hh.shape[1]

    Np = max(16, _round_up(N, 16))      # bf16-friendly sublane padding
    Hp = max(128, _round_up(H, 128))    # lane-width multiple
    Ep = max(16, _round_up(E, 16))

    # Batch tiling ("parallel" grid axis).
    if Np <= 256:
        Bt = Np
    else:
        Bt = 256
        Np = _round_up(Np, Bt)
    n_btiles = Np // Bt

    # Time blocking ("arbitrary" grid axis): size Tb so the double-buffered
    # streamed block + projection scratch stay within ~8 MiB.
    bytes_per_t = Bt * Ep * 2 * 2 + Bt * 4 * Hp * 4
    Tb = int(max(1, min(T, (8 << 20) // bytes_per_t)))
    n_tblocks = pl.cdiv(T, Tb)
    T_pad = n_tblocks * Tb

    # Adaptive unroll: deep unroll only when the live gate tile is small.
    if Bt <= 16 and Hp <= 256:
        unroll = 8
    elif Hp <= 512:
        unroll = 4
    else:
        unroll = 2
    unroll = min(unroll, Tb)

    # Gate-padded weight / bias layouts (padded lanes/rows exactly zero so the
    # padded hidden lanes stay inert; zeros are exact under the bf16 cast).
    wih_t = _gate_padded_weight_t(w_ih, H, Hp)                   # (E, 4*Hp)
    wih_t = jnp.pad(wih_t, ((0, Ep - E), (0, 0))).astype(jnp.bfloat16)
    whh_t = _gate_padded_weight_t(w_hh, H, Hp)                   # (H, 4*Hp)
    whh_t = jnp.pad(whh_t, ((0, Hp - H), (0, 0))).astype(jnp.bfloat16)
    bias = jnp.pad(b.reshape(4, H), ((0, 0), (0, Hp - H))).reshape(1, 4 * Hp)
    bias = bias.astype(jnp.float32)

    # Embedding lookup (gather over the table, padding_idx=0 rows are zero)
    # stays in plain JAX glue; the E-wide bf16 embeddings are what we stream.
    tok_tm = input_tensor.T                                      # (T, N)
    x = jnp.take(emb, tok_tm.reshape(-1), axis=0).reshape(T, N, E)
    x = jnp.pad(x, ((0, T_pad - T), (0, Np - N), (0, Ep - E)))
    x = x.astype(jnp.bfloat16)                                   # (T_pad, Np, Ep)

    kernel = functools.partial(lstm_block_kernel, Tb=Tb, Hp=Hp,
                               T_total=T, unroll=unroll)

    # VMEM budget: double-buffered streamed block + resident weights/state/scratch.
    vmem_need = (2 * Tb * Bt * Ep * 2          # x block (bf16, double-buffered)
                 + Ep * 4 * Hp * 2             # W_ih^T (bf16)
                 + Hp * 4 * Hp * 2             # W_hh^T (bf16)
                 + 4 * Hp * 4                  # bias
                 + 2 * 2 * Bt * Hp * 4         # hn / cn tiles
                 + Tb * Bt * 4 * Hp * 4)       # projection scratch
    vmem_limit = int(min(64 << 20, max(32 << 20, 2 * vmem_need + (2 << 20))))

    hn_p, cn_p = pl.pallas_call(
        kernel,
        grid=(n_btiles, n_tblocks),
        in_specs=[
            pl.BlockSpec((Tb, Bt, Ep), lambda bt, tt: (tt, bt, 0)),   # x (streamed)
            pl.BlockSpec((Ep, 4 * Hp), lambda bt, tt: (0, 0)),        # W_ih^T (resident)
            pl.BlockSpec((1, 4 * Hp), lambda bt, tt: (0, 0)),         # bias (resident)
            pl.BlockSpec((Hp, 4 * Hp), lambda bt, tt: (0, 0)),        # W_hh^T (resident)
        ],
        out_specs=(
            pl.BlockSpec((Bt, Hp), lambda bt, tt: (bt, 0)),           # hn (carried)
            pl.BlockSpec((Bt, Hp), lambda bt, tt: (bt, 0)),           # cn (carried)
        ),
        out_shape=(
            jax.ShapeDtypeStruct((Np, Hp), jnp.float32),
            jax.ShapeDtypeStruct((Np, Hp), jnp.float32),
        ),
        scratch_shapes=[pltpu.VMEM((Tb, Bt, 4 * Hp), jnp.float32)],
        compiler_params=pltpu.CompilerParams(
            dimension_semantics=("parallel", "arbitrary"),
            vmem_limit_bytes=vmem_limit,
        ),
    )(x, wih_t, bias, whh_t)

    hn = hn_p[:N, :H][None, :, :]                                # (1, N, H)
    cn = cn_p[:N, :H][None, :, :]
    return hn, cn


def make_params(key, vocab_size, embedding_dim, hidden_size):
    k_emb, k_wih, k_whh, k_bih, k_bhh = jax.random.split(key, 5)
    bound = 1.0 / np.sqrt(hidden_size)
    emb = jax.random.normal(k_emb, (vocab_size, embedding_dim), jnp.float32)
    emb = emb.at[0].set(0.0)                                     # padding_idx=0
    w_ih = jax.random.uniform(k_wih, (4 * hidden_size, embedding_dim),
                              jnp.float32, -bound, bound)
    w_hh = jax.random.uniform(k_whh, (4 * hidden_size, hidden_size),
                              jnp.float32, -bound, bound)
    b_ih = jax.random.uniform(k_bih, (4 * hidden_size,), jnp.float32, -bound, bound)
    b_hh = jax.random.uniform(k_bhh, (4 * hidden_size,), jnp.float32, -bound, bound)
    return {"embedding": emb, "w_ih": w_ih, "w_hh": w_hh, "b_ih": b_ih, "b_hh": b_hh}


def reference_forward(input_tensor, params):
    """Pure-JAX f32 reference reproducing torch.nn.LSTM semantics."""
    emb, w_ih, w_hh, b_ih, b_hh = (
        params["embedding"], params["w_ih"], params["w_hh"],
        params["b_ih"], params["b_hh"],
    )
    H = w_hh.shape[1]
    x = jnp.take(emb, input_tensor, axis=0)            # (N, T, E)
    x = jnp.transpose(x, (1, 0, 2))                    # (T, N, E)
    N = x.shape[1]
    h = jnp.zeros((N, H), jnp.float32)
    c = jnp.zeros((N, H), jnp.float32)

    def step(carry, x_t):
        h, c = carry
        gates = x_t @ w_ih.T + h @ w_hh.T + b_ih + b_hh
        i = jax.nn.sigmoid(gates[:, 0 * H:1 * H])
        f = jax.nn.sigmoid(gates[:, 1 * H:2 * H])
        g = jnp.tanh(gates[:, 2 * H:3 * H])
        o = jax.nn.sigmoid(gates[:, 3 * H:4 * H])
        c = f * c + i * g
        h = o * jnp.tanh(c)
        return (h, c), None

    (h, c), _ = jax.lax.scan(step, (h, c), x)
    return h[None], c[None]


if __name__ == "__main__":
    vocab_size, embedding_dim, hidden_size = 32, 16, 32
    N, seq_len = 2, 8

    key = jax.random.PRNGKey(0)
    k_params, k_tok = jax.random.split(key)
    params = make_params(k_params, vocab_size, embedding_dim, hidden_size)
    input_tensor = jax.random.randint(k_tok, (N, seq_len), 0, vocab_size, jnp.int32)

    hn, cn = encoder_rnn_forward(input_tensor, params)
    jax.block_until_ready((hn, cn))

    hn_ref, cn_ref = reference_forward(input_tensor, params)
    # bf16 MXU operands change summation precision vs. the f32 reference.
    np.testing.assert_allclose(np.asarray(hn), np.asarray(hn_ref), rtol=2e-2, atol=2e-2)
    np.testing.assert_allclose(np.asarray(cn), np.asarray(cn_ref), rtol=2e-2, atol=2e-2)
    assert hn.shape == (1, N, hidden_size) and cn.shape == (1, N, hidden_size)

    print("KERNEL_OK")
</pallas_src>

<mosaic_0001>
module attributes {stable_mosaic.version = 11 : i64} {
  func.func @lstm_block_kernel(%arg0: i32, %arg1: i32, %arg2: memref<8x16x16xbf16, #tpu.memory_space<vmem>>, %arg3: memref<16x512xbf16, #tpu.memory_space<vmem>>, %arg4: memref<1x512xf32, #tpu.memory_space<vmem>>, %arg5: memref<128x512xbf16, #tpu.memory_space<vmem>>, %arg6: memref<16x128xf32, #tpu.memory_space<vmem>>, %arg7: memref<16x128xf32, #tpu.memory_space<vmem>>, %arg8: memref<8x16x512xf32, #tpu.memory_space<vmem>>) attributes {dimension_semantics = [#tpu.dimension_semantics<parallel>, #tpu.dimension_semantics<arbitrary>], iteration_bounds = array<i64: 1, 1>, scalar_prefetch = 0 : i64, scratch_operands = 1 : i64, tpu.core_type = #tpu.core_type<tc>, window_params = [{transform_indices = @transform_0, window_bounds = array<i64: 8, 16, 16>}, {pipeline_mode = #tpu.pipeline_mode<synchronous>, transform_indices = @transform_1, window_bounds = array<i64: 16, 512>}, {pipeline_mode = #tpu.pipeline_mode<synchronous>, transform_indices = @transform_2, window_bounds = array<i64: 1, 512>}, {pipeline_mode = #tpu.pipeline_mode<synchronous>, transform_indices = @transform_3, window_bounds = array<i64: 128, 512>}, {transform_indices = @transform_4, window_bounds = array<i64: 16, 128>}, {transform_indices = @transform_5, window_bounds = array<i64: 16, 128>}]} {
    %c0_i32 = arith.constant 0 : i32
    %0 = arith.cmpi eq, %arg1, %c0_i32 : i32
    %1 = arith.extui %0 : i1 to i32
    %c0_i32_0 = arith.constant 0 : i32
    %2 = arith.cmpi ne, %1, %c0_i32_0 : i32
    scf.if %2 {
      %cst_69 = arith.constant 0.000000e+00 : f32
      %265 = vector.broadcast %cst_69 : f32 to vector<16x128xf32>
      %c0_70 = arith.constant 0 : index
      %c0_71 = arith.constant 0 : index
      %266 = vector.load %arg6[%c0_70, %c0_71] : memref<16x128xf32, #tpu.memory_space<vmem>>, vector<16x128xf32>
      tpu.vector_store %arg6[%c0_70, %c0_71], %265 {strides = array<i32>} : memref<16x128xf32, #tpu.memory_space<vmem>>, vector<16x128xf32>,
      %cst_72 = arith.constant 0.000000e+00 : f32
      %267 = vector.broadcast %cst_72 : f32 to vector<16x128xf32>
      %c0_73 = arith.constant 0 : index
      %c0_74 = arith.constant 0 : index
      %268 = vector.load %arg7[%c0_73, %c0_74] : memref<16x128xf32, #tpu.memory_space<vmem>>, vector<16x128xf32>
      tpu.vector_store %arg7[%c0_73, %c0_74], %267 {strides = array<i32>} : memref<16x128xf32, #tpu.memory_space<vmem>>, vector<16x128xf32>,
    } else {
    }
    %c0 = arith.constant 0 : index
    %c0_1 = arith.constant 0 : index
    %c0_2 = arith.constant 0 : index
    %3 = vector.load %arg2[%c0, %c0_1, %c0_2] : memref<8x16x16xbf16, #tpu.memory_space<vmem>>, vector<8x16x16xbf16>
    %4 = vector.shape_cast %3 : vector<8x16x16xbf16> to vector<128x16xbf16>
    %c0_3 = arith.constant 0 : index
    %c0_4 = arith.constant 0 : index
    %5 = vector.load %arg3[%c0_3, %c0_4] : memref<16x512xbf16, #tpu.memory_space<vmem>>, vector<16x512xbf16>
    %cst = arith.constant dense<0.000000e+00> : vector<128x512xf32>
    %6 = tpu.matmul %4, %5, %cst {dimension_numbers = #tpu.dot_dimension_numbers<[1], [0], [0], [1], [0, 0, 1, 1], [], []>} : vector<128x16xbf16>, vector<16x512xbf16>, vector<128x512xf32> -> vector<128x512xf32>
    %c0_5 = arith.constant 0 : index
    %c0_6 = arith.constant 0 : index
    %7 = vector.load %arg4[%c0_5, %c0_6] : memref<1x512xf32, #tpu.memory_space<vmem>>, vector<1x512xf32>
    %8 = vector.broadcast %7 : vector<1x512xf32> to vector<128x512xf32>
    %9 = arith.addf %6, %8 : vector<128x512xf32>
    %10 = vector.shape_cast %9 : vector<128x512xf32> to vector<8x16x512xf32>
    %c0_7 = arith.constant 0 : index
    %c0_8 = arith.constant 0 : index
    %c0_9 = arith.constant 0 : index
    %11 = vector.load %arg8[%c0_7, %c0_8, %c0_9] : memref<8x16x512xf32, #tpu.memory_space<vmem>>, vector<8x16x512xf32>
    tpu.vector_store %arg8[%c0_7, %c0_8, %c0_9], %10 {strides = array<i32>} : memref<8x16x512xf32, #tpu.memory_space<vmem>>, vector<8x16x512xf32>,
    %c0_10 = arith.constant 0 : index
    %c0_11 = arith.constant 0 : index
    %12 = vector.load %arg5[%c0_10, %c0_11] : memref<128x512xbf16, #tpu.memory_space<vmem>>, vector<128x512xbf16>
    %c0_12 = arith.constant 0 : index
    %c0_13 = arith.constant 0 : index
    %13 = vector.load %arg6[%c0_12, %c0_13] : memref<16x128xf32, #tpu.memory_space<vmem>>, vector<16x128xf32>
    %c0_14 = arith.constant 0 : index
    %c0_15 = arith.constant 0 : index
    %14 = vector.load %arg7[%c0_14, %c0_15] : memref<16x128xf32, #tpu.memory_space<vmem>>, vector<16x128xf32>
    %c0_i32_16 = arith.constant 0 : i32
    %15 = arith.index_cast %c0_i32_16 : i32 to index
    %c0_17 = arith.constant 0 : index
    %c0_18 = arith.constant 0 : index
    %16 = vector.load %arg8[%15, %c0_17, %c0_18] : memref<8x16x512xf32, #tpu.memory_space<vmem>>, vector<1x16x512xf32>
    %17 = vector.shape_cast %16 : vector<1x16x512xf32> to vector<16x512xf32>
    %18 = arith.truncf %13 : vector<16x128xf32> to vector<16x128xbf16>
    %cst_19 = arith.constant dense<0.000000e+00> : vector<16x512xf32>
    %19 = tpu.matmul %18, %12, %cst_19 {dimension_numbers = #tpu.dot_dimension_numbers<[1], [0], [0], [1], [0, 0, 1, 1], [], []>} : vector<16x128xbf16>, vector<128x512xbf16>, vector<16x512xf32> -> vector<16x512xf32>
    %20 = arith.addf %17, %19 : vector<16x512xf32>
    %21 = vector.extract_strided_slice %20 {offsets = [0, 0], sizes = [16, 128], strides = [1, 1]} : vector<16x512xf32> to vector<16x128xf32>
    %22 = arith.negf %21 : vector<16x128xf32>
    %23 = math.exp %22 : vector<16x128xf32>
    %cst_20 = arith.constant 1.000000e+00 : f32
    %24 = vector.broadcast %cst_20 : f32 to vector<16x128xf32>
    %25 = arith.addf %24, %23 : vector<16x128xf32>
    %26 = arith.divf %24, %25 : vector<16x128xf32>
    %27 = vector.extract_strided_slice %20 {offsets = [0, 128], sizes = [16, 128], strides = [1, 1]} : vector<16x512xf32> to vector<16x128xf32>
    %28 = arith.negf %27 : vector<16x128xf32>
    %29 = math.exp %28 : vector<16x128xf32>
    %cst_21 = arith.constant 1.000000e+00 : f32
    %30 = vector.broadcast %cst_21 : f32 to vector<16x128xf32>
    %31 = arith.addf %30, %29 : vector<16x128xf32>
    %32 = arith.divf %30, %31 : vector<16x128xf32>
    %33 = vector.extract_strided_slice %20 {offsets = [0, 256], sizes = [16, 128], strides = [1, 1]} : vector<16x512xf32> to vector<16x128xf32>
    %34 = math.tanh %33 : vector<16x128xf32>
    %35 = vector.extract_strided_slice %20 {offsets = [0, 384], sizes = [16, 128], strides = [1, 1]} : vector<16x512xf32> to vector<16x128xf32>
    %36 = arith.negf %35 : vector<16x128xf32>
    %37 = math.exp %36 : vector<16x128xf32>
    %cst_22 = arith.constant 1.000000e+00 : f32
    %38 = vector.broadcast %cst_22 : f32 to vector<16x128xf32>
    %39 = arith.addf %38, %37 : vector<16x128xf32>
    %40 = arith.divf %38, %39 : vector<16x128xf32>
    %41 = arith.mulf %32, %14 : vector<16x128xf32>
    %42 = arith.mulf %26, %34 : vector<16x128xf32>
    %43 = arith.addf %41, %42 : vector<16x128xf32>
    %44 = math.tanh %43 : vector<16x128xf32>
    %45 = arith.mulf %40, %44 : vector<16x128xf32>
    %c1_i32 = arith.constant 1 : i32
    %46 = arith.index_cast %c1_i32 : i32 to index
    %c0_23 = arith.constant 0 : index
    %c0_24 = arith.constant 0 : index
    %47 = vector.load %arg8[%46, %c0_23, %c0_24] : memref<8x16x512xf32, #tpu.memory_space<vmem>>, vector<1x16x512xf32>
    %48 = vector.shape_cast %47 : vector<1x16x512xf32> to vector<16x512xf32>
    %49 = arith.truncf %45 : vector<16x128xf32> to vector<16x128xbf16>
    %cst_25 = arith.constant dense<0.000000e+00> : vector<16x512xf32>
    %50 = tpu.matmul %49, %12, %cst_25 {dimension_numbers = #tpu.dot_dimension_numbers<[1], [0], [0], [1], [0, 0, 1, 1], [], []>} : vector<16x128xbf16>, vector<128x512xbf16>, vector<16x512xf32> -> vector<16x512xf32>
    %51 = arith.addf %48, %50 : vector<16x512xf32>
    %52 = vector.extract_strided_slice %51 {offsets = [0, 0], sizes = [16, 128], strides = [1, 1]} : vector<16x512xf32> to vector<16x128xf32>
    %53 = arith.negf %52 : vector<16x128xf32>
    %54 = math.exp %53 : vector<16x128xf32>
    %cst_26 = arith.constant 1.000000e+00 : f32
    %55 = vector.broadcast %cst_26 : f32 to vector<16x128xf32>
    %56 = arith.addf %55, %54 : vector<16x128xf32>
    %57 = arith.divf %55, %56 : vector<16x128xf32>
    %58 = vector.extract_strided_slice %51 {offsets = [0, 128], sizes = [16, 128], strides = [1, 1]} : vector<16x512xf32> to vector<16x128xf32>
    %59 = arith.negf %58 : vector<16x128xf32>
    %60 = math.exp %59 : vector<16x128xf32>
    %cst_27 = arith.constant 1.000000e+00 : f32
    %61 = vector.broadcast %cst_27 : f32 to vector<16x128xf32>
    %62 = arith.addf %61, %60 : vector<16x128xf32>
    %63 = arith.divf %61, %62 : vector<16x128xf32>
    %64 = vector.extract_strided_slice %51 {offsets = [0, 256], sizes = [16, 128], strides = [1, 1]} : vector<16x512xf32> to vector<16x128xf32>
    %65 = math.tanh %64 : vector<16x128xf32>
    %66 = vector.extract_strided_slice %51 {offsets = [0, 384], sizes = [16, 128], strides = [1, 1]} : vector<16x512xf32> to vector<16x128xf32>
    %67 = arith.negf %66 : vector<16x128xf32>
    %68 = math.exp %67 : vector<16x128xf32>
    %cst_28 = arith.constant 1.000000e+00 : f32
    %69 = vector.broadcast %cst_28 : f32 to vector<16x128xf32>
    %70 = arith.addf %69, %68 : vector<16x128xf32>
    %71 = arith.divf %69, %70 : vector<16x128xf32>
    %72 = arith.mulf %63, %43 : vector<16x128xf32>
    %73 = arith.mulf %57, %65 : vector<16x128xf32>
    %74 = arith.addf %72, %73 : vector<16x128xf32>
    %75 = math.tanh %74 : vector<16x128xf32>
    %76 = arith.mulf %71, %75 : vector<16x128xf32>
    %c2_i32 = arith.constant 2 : i32
    %77 = arith.index_cast %c2_i32 : i32 to index
    %c0_29 = arith.constant 0 : index
    %c0_30 = arith.constant 0 : index
    %78 = vector.load %arg8[%77, %c0_29, %c0_30] : memref<8x16x512xf32, #tpu.memory_space<vmem>>, vector<1x16x512xf32>
    %79 = vector.shape_cast %78 : vector<1x16x512xf32> to vector<16x512xf32>
    %80 = arith.truncf %76 : vector<16x128xf32> to vector<16x128xbf16>
    %cst_31 = arith.constant dense<0.000000e+00> : vector<16x512xf32>
    %81 = tpu.matmul %80, %12, %cst_31 {dimension_numbers = #tpu.dot_dimension_numbers<[1], [0], [0], [1], [0, 0, 1, 1], [], []>} : vector<16x128xbf16>, vector<128x512xbf16>, vector<16x512xf32> -> vector<16x512xf32>
    %82 = arith.addf %79, %81 : vector<16x512xf32>
    %83 = vector.extract_strided_slice %82 {offsets = [0, 0], sizes = [16, 128], strides = [1, 1]} : vector<16x512xf32> to vector<16x128xf32>
    %84 = arith.negf %83 : vector<16x128xf32>
    %85 = math.exp %84 : vector<16x128xf32>
    %cst_32 = arith.constant 1.000000e+00 : f32
    %86 = vector.broadcast %cst_32 : f32 to vector<16x128xf32>
    %87 = arith.addf %86, %85 : vector<16x128xf32>
    %88 = arith.divf %86, %87 : vector<16x128xf32>
    %89 = vector.extract_strided_slice %82 {offsets = [0, 128], sizes = [16, 128], strides = [1, 1]} : vector<16x512xf32> to vector<16x128xf32>
    %90 = arith.negf %89 : vector<16x128xf32>
    %91 = math.exp %90 : vector<16x128xf32>
    %cst_33 = arith.constant 1.000000e+00 : f32
    %92 = vector.broadcast %cst_33 : f32 to vector<16x128xf32>
    %93 = arith.addf %92, %91 : vector<16x128xf32>
    %94 = arith.divf %92, %93 : vector<16x128xf32>
    %95 = vector.extract_strided_slice %82 {offsets = [0, 256], sizes = [16, 128], strides = [1, 1]} : vector<16x512xf32> to vector<16x128xf32>
    %96 = math.tanh %95 : vector<16x128xf32>
    %97 = vector.extract_strided_slice %82 {offsets = [0, 384], sizes = [16, 128], strides = [1, 1]} : vector<16x512xf32> to vector<16x128xf32>
    %98 = arith.negf %97 : vector<16x128xf32>
    %99 = math.exp %98 : vector<16x128xf32>
    %cst_34 = arith.constant 1.000000e+00 : f32
    %100 = vector.broadcast %cst_34 : f32 to vector<16x128xf32>
    %101 = arith.addf %100, %99 : vector<16x128xf32>
    %102 = arith.divf %100, %101 : vector<16x128xf32>
    %103 = arith.mulf %94, %74 : vector<16x128xf32>
    %104 = arith.mulf %88, %96 : vector<16x128xf32>
    %105 = arith.addf %103, %104 : vector<16x128xf32>
    %106 = math.tanh %105 : vector<16x128xf32>
    %107 = arith.mulf %102, %106 : vector<16x128xf32>
    %c3_i32 = arith.constant 3 : i32
    %108 = arith.index_cast %c3_i32 : i32 to index
    %c0_35 = arith.constant 0 : index
    %c0_36 = arith.constant 0 : index
    %109 = vector.load %arg8[%108, %c0_35, %c0_36] : memref<8x16x512xf32, #tpu.memory_space<vmem>>, vector<1x16x512xf32>
    %110 = vector.shape_cast %109 : vector<1x16x512xf32> to vector<16x512xf32>
    %111 = arith.truncf %107 : vector<16x128xf32> to vector<16x128xbf16>
    %cst_37 = arith.constant dense<0.000000e+00> : vector<16x512xf32>
    %112 = tpu.matmul %111, %12, %cst_37 {dimension_numbers = #tpu.dot_dimension_numbers<[1], [0], [0], [1], [0, 0, 1, 1], [], []>} : vector<16x128xbf16>, vector<128x512xbf16>, vector<16x512xf32> -> vector<16x512xf32>
    %113 = arith.addf %110, %112 : vector<16x512xf32>
    %114 = vector.extract_strided_slice %113 {offsets = [0, 0], sizes = [16, 128], strides = [1, 1]} : vector<16x512xf32> to vector<16x128xf32>
    %115 = arith.negf %114 : vector<16x128xf32>
    %116 = math.exp %115 : vector<16x128xf32>
    %cst_38 = arith.constant 1.000000e+00 : f32
    %117 = vector.broadcast %cst_38 : f32 to vector<16x128xf32>
    %118 = arith.addf %117, %116 : vector<16x128xf32>
    %119 = arith.divf %117, %118 : vector<16x128xf32>
    %120 = vector.extract_strided_slice %113 {offsets = [0, 128], sizes = [16, 128], strides = [1, 1]} : vector<16x512xf32> to vector<16x128xf32>
    %121 = arith.negf %120 : vector<16x128xf32>
    %122 = math.exp %121 : vector<16x128xf32>
    %cst_39 = arith.constant 1.000000e+00 : f32
    %123 = vector.broadcast %cst_39 : f32 to vector<16x128xf32>
    %124 = arith.addf %123, %122 : vector<16x128xf32>
    %125 = arith.divf %123, %124 : vector<16x128xf32>
    %126 = vector.extract_strided_slice %113 {offsets = [0, 256], sizes = [16, 128], strides = [1, 1]} : vector<16x512xf32> to vector<16x128xf32>
    %127 = math.tanh %126 : vector<16x128xf32>
    %128 = vector.extract_strided_slice %113 {offsets = [0, 384], sizes = [16, 128], strides = [1, 1]} : vector<16x512xf32> to vector<16x128xf32>
    %129 = arith.negf %128 : vector<16x128xf32>
    %130 = math.exp %129 : vector<16x128xf32>
    %cst_40 = arith.constant 1.000000e+00 : f32
    %131 = vector.broadcast %cst_40 : f32 to vector<16x128xf32>
    %132 = arith.addf %131, %130 : vector<16x128xf32>
    %133 = arith.divf %131, %132 : vector<16x128xf32>
    %134 = arith.mulf %125, %105 : vector<16x128xf32>
    %135 = arith.mulf %119, %127 : vector<16x128xf32>
    %136 = arith.addf %134, %135 : vector<16x128xf32>
    %137 = math.tanh %136 : vector<16x128xf32>
    %138 = arith.mulf %133, %137 : vector<16x128xf32>
    %c4_i32 = arith.constant 4 : i32
    %139 = arith.index_cast %c4_i32 : i32 to index
    %c0_41 = arith.constant 0 : index
    %c0_42 = arith.constant 0 : index
    %140 = vector.load %arg8[%139, %c0_41, %c0_42] : memref<8x16x512xf32, #tpu.memory_space<vmem>>, vector<1x16x512xf32>
    %141 = vector.shape_cast %140 : vector<1x16x512xf32> to vector<16x512xf32>
    %142 = arith.truncf %138 : vector<16x128xf32> to vector<16x128xbf16>
    %cst_43 = arith.constant dense<0.000000e+00> : vector<16x512xf32>
    %143 = tpu.matmul %142, %12, %cst_43 {dimension_numbers = #tpu.dot_dimension_numbers<[1], [0], [0], [1], [0, 0, 1, 1], [], []>} : vector<16x128xbf16>, vector<128x512xbf16>, vector<16x512xf32> -> vector<16x512xf32>
    %144 = arith.addf %141, %143 : vector<16x512xf32>
    %145 = vector.extract_strided_slice %144 {offsets = [0, 0], sizes = [16, 128], strides = [1, 1]} : vector<16x512xf32> to vector<16x128xf32>
    %146 = arith.negf %145 : vector<16x128xf32>
    %147 = math.exp %146 : vector<16x128xf32>
    %cst_44 = arith.constant 1.000000e+00 : f32
    %148 = vector.broadcast %cst_44 : f32 to vector<16x128xf32>
    %149 = arith.addf %148, %147 : vector<16x128xf32>
    %150 = arith.divf %148, %149 : vector<16x128xf32>
    %151 = vector.extract_strided_slice %144 {offsets = [0, 128], sizes = [16, 128], strides = [1, 1]} : vector<16x512xf32> to vector<16x128xf32>
    %152 = arith.negf %151 : vector<16x128xf32>
    %153 = math.exp %152 : vector<16x128xf32>
    %cst_45 = arith.constant 1.000000e+00 : f32
    %154 = vector.broadcast %cst_45 : f32 to vector<16x128xf32>
    %155 = arith.addf %154, %153 : vector<16x128xf32>
    %156 = arith.divf %154, %155 : vector<16x128xf32>
    %157 = vector.extract_strided_slice %144 {offsets = [0, 256], sizes = [16, 128], strides = [1, 1]} : vector<16x512xf32> to vector<16x128xf32>
    %158 = math.tanh %157 : vector<16x128xf32>
    %159 = vector.extract_strided_slice %144 {offsets = [0, 384], sizes = [16, 128], strides = [1, 1]} : vector<16x512xf32> to vector<16x128xf32>
    %160 = arith.negf %159 : vector<16x128xf32>
    %161 = math.exp %160 : vector<16x128xf32>
    %cst_46 = arith.constant 1.000000e+00 : f32
    %162 = vector.broadcast %cst_46 : f32 to vector<16x128xf32>
    %163 = arith.addf %162, %161 : vector<16x128xf32>
    %164 = arith.divf %162, %163 : vector<16x128xf32>
    %165 = arith.mulf %156, %136 : vector<16x128xf32>
    %166 = arith.mulf %150, %158 : vector<16x128xf32>
    %167 = arith.addf %165, %166 : vector<16x128xf32>
    %168 = math.tanh %167 : vector<16x128xf32>
    %169 = arith.mulf %164, %168 : vector<16x128xf32>
    %c5_i32 = arith.constant 5 : i32
    %170 = arith.index_cast %c5_i32 : i32 to index
    %c0_47 = arith.constant 0 : index
    %c0_48 = arith.constant 0 : index
    %171 = vector.load %arg8[%170, %c0_47, %c0_48] : memref<8x16x512xf32, #tpu.memory_space<vmem>>, vector<1x16x512xf32>
    %172 = vector.shape_cast %171 : vector<1x16x512xf32> to vector<16x512xf32>
    %173 = arith.truncf %169 : vector<16x128xf32> to vector<16x128xbf16>
    %cst_49 = arith.constant dense<0.000000e+00> : vector<16x512xf32>
    %174 = tpu.matmul %173, %12, %cst_49 {dimension_numbers = #tpu.dot_dimension_numbers<[1], [0], [0], [1], [0, 0, 1, 1], [], []>} : vector<16x128xbf16>, vector<128x512xbf16>, vector<16x512xf32> -> vector<16x512xf32>
    %175 = arith.addf %172, %174 : vector<16x512xf32>
    %176 = vector.extract_strided_slice %175 {offsets = [0, 0], sizes = [16, 128], strides = [1, 1]} : vector<16x512xf32> to vector<16x128xf32>
    %177 = arith.negf %176 : vector<16x128xf32>
    %178 = math.exp %177 : vector<16x128xf32>
    %cst_50 = arith.constant 1.000000e+00 : f32
    %179 = vector.broadcast %cst_50 : f32 to vector<16x128xf32>
    %180 = arith.addf %179, %178 : vector<16x128xf32>
    %181 = arith.divf %179, %180 : vector<16x128xf32>
    %182 = vector.extract_strided_slice %175 {offsets = [0, 128], sizes = [16, 128], strides = [1, 1]} : vector<16x512xf32> to vector<16x128xf32>
    %183 = arith.negf %182 : vector<16x128xf32>
    %184 = math.exp %183 : vector<16x128xf32>
    %cst_51 = arith.constant 1.000000e+00 : f32
    %185 = vector.broadcast %cst_51 : f32 to vector<16x128xf32>
    %186 = arith.addf %185, %184 : vector<16x128xf32>
    %187 = arith.divf %185, %186 : vector<16x128xf32>
    %188 = vector.extract_strided_slice %175 {offsets = [0, 256], sizes = [16, 128], strides = [1, 1]} : vector<16x512xf32> to vector<16x128xf32>
    %189 = math.tanh %188 : vector<16x128xf32>
    %190 = vector.extract_strided_slice %175 {offsets = [0, 384], sizes = [16, 128], strides = [1, 1]} : vector<16x512xf32> to vector<16x128xf32>
    %191 = arith.negf %190 : vector<16x128xf32>
    %192 = math.exp %191 : vector<16x128xf32>
    %cst_52 = arith.constant 1.000000e+00 : f32
    %193 = vector.broadcast %cst_52 : f32 to vector<16x128xf32>
    %194 = arith.addf %193, %192 : vector<16x128xf32>
    %195 = arith.divf %193, %194 : vector<16x128xf32>
    %196 = arith.mulf %187, %167 : vector<16x128xf32>
    %197 = arith.mulf %181, %189 : vector<16x128xf32>
    %198 = arith.addf %196, %197 : vector<16x128xf32>
    %199 = math.tanh %198 : vector<16x128xf32>
    %200 = arith.mulf %195, %199 : vector<16x128xf32>
    %c6_i32 = arith.constant 6 : i32
    %201 = arith.index_cast %c6_i32 : i32 to index
    %c0_53 = arith.constant 0 : index
    %c0_54 = arith.constant 0 : index
    %202 = vector.load %arg8[%201, %c0_53, %c0_54] : memref<8x16x512xf32, #tpu.memory_space<vmem>>, vector<1x16x512xf32>
    %203 = vector.shape_cast %202 : vector<1x16x512xf32> to vector<16x512xf32>
    %204 = arith.truncf %200 : vector<16x128xf32> to vector<16x128xbf16>
    %cst_55 = arith.constant dense<0.000000e+00> : vector<16x512xf32>
    %205 = tpu.matmul %204, %12, %cst_55 {dimension_numbers = #tpu.dot_dimension_numbers<[1], [0], [0], [1], [0, 0, 1, 1], [], []>} : vector<16x128xbf16>, vector<128x512xbf16>, vector<16x512xf32> -> vector<16x512xf32>
    %206 = arith.addf %203, %205 : vector<16x512xf32>
    %207 = vector.extract_strided_slice %206 {offsets = [0, 0], sizes = [16, 128], strides = [1, 1]} : vector<16x512xf32> to vector<16x128xf32>
    %208 = arith.negf %207 : vector<16x128xf32>
    %209 = math.exp %208 : vector<16x128xf32>
    %cst_56 = arith.constant 1.000000e+00 : f32
    %210 = vector.broadcast %cst_56 : f32 to vector<16x128xf32>
    %211 = arith.addf %210, %209 : vector<16x128xf32>
    %212 = arith.divf %210, %211 : vector<16x128xf32>
    %213 = vector.extract_strided_slice %206 {offsets = [0, 128], sizes = [16, 128], strides = [1, 1]} : vector<16x512xf32> to vector<16x128xf32>
    %214 = arith.negf %213 : vector<16x128xf32>
    %215 = math.exp %214 : vector<16x128xf32>
    %cst_57 = arith.constant 1.000000e+00 : f32
    %216 = vector.broadcast %cst_57 : f32 to vector<16x128xf32>
    %217 = arith.addf %216, %215 : vector<16x128xf32>
    %218 = arith.divf %216, %217 : vector<16x128xf32>
    %219 = vector.extract_strided_slice %206 {offsets = [0, 256], sizes = [16, 128], strides = [1, 1]} : vector<16x512xf32> to vector<16x128xf32>
    %220 = math.tanh %219 : vector<16x128xf32>
    %221 = vector.extract_strided_slice %206 {offsets = [0, 384], sizes = [16, 128], strides = [1, 1]} : vector<16x512xf32> to vector<16x128xf32>
    %222 = arith.negf %221 : vector<16x128xf32>
    %223 = math.exp %222 : vector<16x128xf32>
    %cst_58 = arith.constant 1.000000e+00 : f32
    %224 = vector.broadcast %cst_58 : f32 to vector<16x128xf32>
    %225 = arith.addf %224, %223 : vector<16x128xf32>
    %226 = arith.divf %224, %225 : vector<16x128xf32>
    %227 = arith.mulf %218, %198 : vector<16x128xf32>
    %228 = arith.mulf %212, %220 : vector<16x128xf32>
    %229 = arith.addf %227, %228 : vector<16x128xf32>
    %230 = math.tanh %229 : vector<16x128xf32>
    %231 = arith.mulf %226, %230 : vector<16x128xf32>
    %c7_i32 = arith.constant 7 : i32
    %232 = arith.index_cast %c7_i32 : i32 to index
    %c0_59 = arith.constant 0 : index
    %c0_60 = arith.constant 0 : index
    %233 = vector.load %arg8[%232, %c0_59, %c0_60] : memref<8x16x512xf32, #tpu.memory_space<vmem>>, vector<1x16x512xf32>
    %234 = vector.shape_cast %233 : vector<1x16x512xf32> to vector<16x512xf32>
    %235 = arith.truncf %231 : vector<16x128xf32> to vector<16x128xbf16>
    %cst_61 = arith.constant dense<0.000000e+00> : vector<16x512xf32>
    %236 = tpu.matmul %235, %12, %cst_61 {dimension_numbers = #tpu.dot_dimension_numbers<[1], [0], [0], [1], [0, 0, 1, 1], [], []>} : vector<16x128xbf16>, vector<128x512xbf16>, vector<16x512xf32> -> vector<16x512xf32>
    %237 = arith.addf %234, %236 : vector<16x512xf32>
    %238 = vector.extract_strided_slice %237 {offsets = [0, 0], sizes = [16, 128], strides = [1, 1]} : vector<16x512xf32> to vector<16x128xf32>
    %239 = arith.negf %238 : vector<16x128xf32>
    %240 = math.exp %239 : vector<16x128xf32>
    %cst_62 = arith.constant 1.000000e+00 : f32
    %241 = vector.broadcast %cst_62 : f32 to vector<16x128xf32>
    %242 = arith.addf %241, %240 : vector<16x128xf32>
    %243 = arith.divf %241, %242 : vector<16x128xf32>
    %244 = vector.extract_strided_slice %237 {offsets = [0, 128], sizes = [16, 128], strides = [1, 1]} : vector<16x512xf32> to vector<16x128xf32>
    %245 = arith.negf %244 : vector<16x128xf32>
    %246 = math.exp %245 : vector<16x128xf32>
    %cst_63 = arith.constant 1.000000e+00 : f32
    %247 = vector.broadcast %cst_63 : f32 to vector<16x128xf32>
    %248 = arith.addf %247, %246 : vector<16x128xf32>
    %249 = arith.divf %247, %248 : vector<16x128xf32>
    %250 = vector.extract_strided_slice %237 {offsets = [0, 256], sizes = [16, 128], strides = [1, 1]} : vector<16x512xf32> to vector<16x128xf32>
    %251 = math.tanh %250 : vector<16x128xf32>
    %252 = vector.extract_strided_slice %237 {offsets = [0, 384], sizes = [16, 128], strides = [1, 1]} : vector<16x512xf32> to vector<16x128xf32>
    %253 = arith.negf %252 : vector<16x128xf32>
    %254 = math.exp %253 : vector<16x128xf32>
    %cst_64 = arith.constant 1.000000e+00 : f32
    %255 = vector.broadcast %cst_64 : f32 to vector<16x128xf32>
    %256 = arith.addf %255, %254 : vector<16x128xf32>
    %257 = arith.divf %255, %256 : vector<16x128xf32>
    %258 = arith.mulf %249, %229 : vector<16x128xf32>
    %259 = arith.mulf %243, %251 : vector<16x128xf32>
    %260 = arith.addf %258, %259 : vector<16x128xf32>
    %261 = math.tanh %260 : vector<16x128xf32>
    %262 = arith.mulf %257, %261 : vector<16x128xf32>
    %c8_i32 = arith.constant 8 : i32
    %c0_65 = arith.constant 0 : index
    %c0_66 = arith.constant 0 : index
    %263 = vector.load %arg6[%c0_65, %c0_66] : memref<16x128xf32, #tpu.memory_space<vmem>>, vector<16x128xf32>
    tpu.vector_store %arg6[%c0_65, %c0_66], %262 {strides = array<i32>} : memref<16x128xf32, #tpu.memory_space<vmem>>, vector<16x128xf32>,
    %c0_67 = arith.constant 0 : index
    %c0_68 = arith.constant 0 : index
    %264 = vector.load %arg7[%c0_67, %c0_68] : memref<16x128xf32, #tpu.memory_space<vmem>>, vector<16x128xf32>
    tpu.vector_store %arg7[%c0_67, %c0_68], %260 {strides = array<i32>} : memref<16x128xf32, #tpu.memory_space<vmem>>, vector<16x128xf32>,
    return
  }
  func.func @transform_0(%arg0: i32, %arg1: i32) -> (i32, i32, i32) {
    %c0_i32 = arith.constant 0 : i32
    %c0_i32_0 = arith.constant 0 : i32
    return %arg1, %arg0, %c0_i32 : i32, i32, i32
  }
  func.func @transform_1(%arg0: i32, %arg1: i32) -> (i32, i32) {
    %c0_i32 = arith.constant 0 : i32
    %c0_i32_0 = arith.constant 0 : i32
    %c0_i32_1 = arith.constant 0 : i32
    return %c0_i32, %c0_i32_0 : i32, i32
  }
  func.func @transform_2(%arg0: i32, %arg1: i32) -> (i32, i32) {
    %c0_i32 = arith.constant 0 : i32
    %c0_i32_0 = arith.constant 0 : i32
    %c0_i32_1 = arith.constant 0 : i32
    return %c0_i32, %c0_i32_0 : i32, i32
  }
  func.func @transform_3(%arg0: i32, %arg1: i32) -> (i32, i32) {
    %c0_i32 = arith.constant 0 : i32
    %c0_i32_0 = arith.constant 0 : i32
    %c0_i32_1 = arith.constant 0 : i32
    return %c0_i32, %c0_i32_0 : i32, i32
  }
  func.func @transform_4(%arg0: i32, %arg1: i32) -> (i32, i32) {
    %c0_i32 = arith.constant 0 : i32
    %c0_i32_0 = arith.constant 0 : i32
    return %arg0, %c0_i32 : i32, i32
  }
  func.func @transform_5(%arg0: i32, %arg1: i32) -> (i32, i32) {
    %c0_i32 = arith.constant 0 : i32
    %c0_i32_0 = arith.constant 0 : i32
    return %arg0, %c0_i32 : i32, i32
  }
}

</mosaic_0001>

<bundles_post_ra>
// kernel: encoder_rnn_forward.1
= control target key start
LH: loop header
LB: loop body
LE: loop exit
PB: predicated region body
PF: predicated region fallthrough
CT: control target
= control target key end

     0   :  { %v2456_v1 = vmov 0   ;;  %vm130_vm0 = vcmask 130048   ;;  %v2457_v45 = vmov 0.0|0.0   ;;  %v50_v46 = vlaneseq  ;;  %s3291_s1 = inlined_call_operand.vmem [shape: bf16[16,512], index: 1, kind: input, shape index: {}]   ;;  %s3292_s0 = inlined_call_operand.vmem [shape: bf16[8,16,16], index: 0, kind: input, shape index: {}]   ;;  %s3293_s3 = inlined_call_operand.vmem [shape: bf16[128,512], index: 3, kind: input, shape index: {}]   ;;  %s3294_s2 = inlined_call_operand.vmem [shape: f32[1,512], index: 2, kind: input, shape index: {}]   ;;  %s3295_s5 = inlined_call_operand.vmem [shape: f32[16,128], index: 5, kind: output, shape index: {1}]   ;;  %s3296_s4 = inlined_call_operand.vmem [shape: f32[16,128], index: 4, kind: output, shape index: {0}]  }
   0x1   :  { %v2106_v0 = vld [vmem:[%s3291_s1 + $0x4] ss:$16 sps:$4 sm:$0xff]   ;;  %187 = vmatprep.mubr.bf16.mxu0 %v2456_v1  ;;  %300 = vmatprep.mubr.bf16.mxu1 %v2456_v1  ;;  %v2108_v2 = vld [vmem:[%s3291_s1 + $0xc] ss:$16 sps:$4 sm:$0xff]   ;;  %v2110_v3 = vld [vmem:[%s3291_s1] ss:$16 sps:$4 sm:$0xff]  }
   0x2   :  { %155 = vmatprep.subr.bf16.mxu0 %v2106_v0  ;;  %v2111_v4 = vld [vmem:[%s3291_s1 + $0x8] ss:$16 sps:$4 sm:$0xff]   ;;  %268 = vmatprep.subr.bf16.mxu1 %v2108_v2  ;;  %v2112_v5 = vld [vmem:[%s3292_s0] sm:$0xff]   ;;  %v2533_v10 = vld [vmem:[%s3293_s3 + $0xc] ss:$16 sps:$4 sm:$0xff]   ;;  %v51_v47 = vshrl.u32 %v50_v46, 7 }
   0x3   :  { %156 = vmatpush1.bf16.msra.mxu0 %v2110_v3  ;;  %269 = vmatpush1.bf16.msra.mxu1 %v2111_v4  ;;  %v2508_v6 = vld [vmem:[%s3293_s3 + $0x4] ss:$16 sps:$4 sm:$0xff]   ;;  %v2513_v7 = vld [vmem:[%s3293_s3] ss:$16 sps:$4 sm:$0xff]   ;;  %v2116_v11 = vld [vmem:[%s3292_s0 + $0x8] sm:$0xff]  }
   0x4   :  { %650 = vmatprep.subr.bf16.mxu0 %v2508_v6  ;;  %v2519_v8 = vld [vmem:[%s3293_s3 + $0x24] ss:$16 sps:$4 sm:$0xff]   ;;  %v2526_v9 = vld [vmem:[%s3293_s3 + $0x20] ss:$16 sps:$4 sm:$0xff]   ;;  %693 = vmatprep.subr.bf16.mxu1 %v2533_v10  ;;  %v2549_v13 = vld [vmem:[%s3293_s3 + $0x8] ss:$16 sps:$4 sm:$0xff]  }
   0x5   :  { %v2544_v12 = vld [vmem:[%s3293_s3 + $0x44] ss:$16 sps:$4 sm:$0xff]   ;;  %v2554_v14 = vld [vmem:[%s3293_s3 + $0x2c] ss:$16 sps:$4 sm:$0xff]   ;;  %v2562_v15 = vld [vmem:[%s3293_s3 + $0x40] ss:$16 sps:$4 sm:$0xff]  }
   0x6   :  { %1880 = vmatmul.mubr.msk.bf16.vlgmr.msra.gmra.mrb[0].mxu0 %vm130_vm0, %v2112_v5  ;;  %1888 = vmatmul.mubr.msk.bf16.vlgmr.msra.gmra.mrb[0].mxu1 %vm130_vm0, %v2112_v5  ;;  %v2568_v16 = vld [vmem:[%s3293_s3 + $0x64] ss:$16 sps:$4 sm:$0xff]   ;;  %v2573_v17 = vld [vmem:[%s3293_s3 + $0x28] ss:$16 sps:$4 sm:$0xff]   ;;  %v2580_v18 = vld [vmem:[%s3293_s3 + $0x4c] ss:$16 sps:$4 sm:$0xff]  }
   0x7   :  { %651 = vmatpush1.bf16.msra.mxu0 %v2513_v7  ;;  %197 = vmatprep.mubr.bf16.mxu0 %v2456_v1  ;;  %v2122_v19 = vld [vmem:[%s3292_s0 + $0x10] sm:$0xff]   ;;  %v2597_v21 = vld [vmem:[%s3293_s3 + $0x48] ss:$16 sps:$4 sm:$0xff]   ;;  %v2609_v23 = vld [vmem:[%s3293_s3 + $0x6c] ss:$16 sps:$4 sm:$0xff]   ;;  %v52_v48 = vsub.s32 0, %v51_v47 }
   0x8   :  { %310 = vmatprep.mubr.bf16.mxu1 %v2456_v1  ;;  %652 = vmatprep.subr.bf16.mxu0 %v2519_v8  ;;  %v2592_v20 = vld [vmem:[%s3293_s3 + $0x60] ss:$16 sps:$4 sm:$0xff]   ;;  %v2604_v22 = vld [vmem:[%s3293_s3 + $0x84] ss:$16 sps:$4 sm:$0xff]   ;;  %v2626_v26 = vld [vmem:[%s3293_s3 + $0x68] ss:$16 sps:$4 sm:$0xff]  }
   0x9   :  { %694 = vmatpush1.bf16.msra.mxu1 %v2549_v13  ;;  %v2616_v24 = vld [vmem:[%s3293_s3 + $0x80] ss:$16 sps:$4 sm:$0xff]   ;;  %v2621_v25 = vld [vmem:[%s3293_s3 + $0xa4] ss:$16 sps:$4 sm:$0xff]   ;;  %v2633_v27 = vld [vmem:[%s3293_s3 + $0x8c] ss:$16 sps:$4 sm:$0xff]  }
   0xa   :  { %695 = vmatprep.subr.bf16.mxu1 %v2554_v14  ;;  %v2644_v28 = vld [vmem:[%s3293_s3 + $0xa0] ss:$16 sps:$4 sm:$0xff]   ;;  %v2649_v29 = vld [vmem:[%s3293_s3 + $0x88] ss:$16 sps:$4 sm:$0xff]   ;;  %v2656_v30 = vld [vmem:[%s3293_s3 + $0xc4] ss:$16 sps:$4 sm:$0xff]  }
   0xb   :  { %653 = vmatpush1.bf16.msra.mxu0 %v2526_v9  ;;  %v2661_v31 = vld [vmem:[%s3293_s3 + $0xac] ss:$16 sps:$4 sm:$0xff]   ;;  %v2669_v33 = vld [vmem:[%s3293_s3 + $0xc0] ss:$16 sps:$4 sm:$0xff]   ;;  %v2676_v34 = vld [vmem:[%s3293_s3 + $0xa8] ss:$16 sps:$4 sm:$0xff]  }
   0xc   :  { %654 = vmatprep.subr.bf16.mxu0 %v2544_v12  ;;  %v2129_v32 = vld [vmem:[%s3292_s0 + $0x18] sm:$0xff]   ;;  %v2683_v35 = vld [vmem:[%s3293_s3 + $0xe4] ss:$16 sps:$4 sm:$0xff]   ;;  %v2699_v37 = vld [vmem:[%s3293_s3 + $0xe0] ss:$16 sps:$4 sm:$0xff]   ;;  %v56_v50 = vsub.s32 1, %v51_v47 }
   0xd   :  { %696 = vmatpush1.bf16.msra.mxu1 %v2573_v17  ;;  %v2688_v36 = vld [vmem:[%s3293_s3 + $0xcc] ss:$16 sps:$4 sm:$0xff]   ;;  %v2704_v38 = vld [vmem:[%s3293_s3 + $0xc8] ss:$16 sps:$4 sm:$0xff]   ;;  %v2136_v40 = vld [vmem:[%s3292_s0 + $0x20] sm:$0xff]   ;;  %v64_v55 = vsub.s32 3, %v51_v47 }
   0xe   :  { %1881 = vmatmul.mubr.msk.bf16.gmra.mrb[4].mxu0 %vm130_vm0, %v2116_v11  ;;  %1889 = vmatmul.mubr.msk.bf16.gmra.mrb[4].mxu1 %vm130_vm0, %v2116_v11  ;;  %v2711_v39 = vld [vmem:[%s3293_s3 + $0xec] ss:$16 sps:$4 sm:$0xff]   ;;  %v2721_v41 = vld [vmem:[%s3293_s3 + $0xe8] ss:$16 sps:$4 sm:$0xff]   ;;  %v2150_v43 = vld [vmem:[%s3292_s0 + $0x30] sm:$0xff]   ;;  %v60_v63 = vsub.s32 2, %v51_v47 }
   0xf   :  { %207 = vmatprep.mubr.bf16.mxu0 %v2456_v1  ;;  %320 = vmatprep.mubr.bf16.mxu1 %v2456_v1  ;;  %v2143_v42 = vld [vmem:[%s3292_s0 + $0x28] sm:$0xff]   ;;  %v2158_v44 = vld [vmem:[%s3292_s0 + $0x38] sm:$0xff]   ;;  %v48_v49 = vld [vmem:[%s3294_s2] sm:$0xf] }
  0x10   :  { %655 = vmatpush1.bf16.msra.mxu0 %v2562_v15  ;;  %697 = vmatprep.subr.bf16.mxu1 %v2580_v18  ;;  %v2789_v51 = vrot.slane %v48_v49, %v52_v48  ;;  %v2791_v52 = vrot.slane %v48_v49, %v56_v50  ;;  %v2796_v5 = vrot.slane %v48_v49, %v64_v55 }
  0x11   :  { %656 = vmatprep.subr.bf16.mxu0 %v2568_v16  ;;  %698 = vmatpush1.bf16.msra.mxu1 %v2597_v21 }
  0x12   :  { %699 = vmatprep.subr.bf16.mxu1 %v2609_v23 }
  0x14   :  { %657 = vmatpush1.bf16.msra.mxu0 %v2592_v20 }
  0x15   :  { %658 = vmatprep.subr.bf16.mxu0 %v2604_v22  ;;  %700 = vmatpush1.bf16.msra.mxu1 %v2626_v26 }
  0x16   :  { %1882 = vmatmul.mubr.msk.bf16.gmra.mrb[8].mxu0 %vm130_vm0, %v2122_v19  ;;  %1890 = vmatmul.mubr.msk.bf16.gmra.mrb[8].mxu1 %vm130_vm0, %v2122_v19 }
  0x17   :  { %217 = vmatprep.mubr.bf16.mxu0 %v2456_v1  ;;  %330 = vmatprep.mubr.bf16.mxu1 %v2456_v1 }
  0x18   :  { %659 = vmatpush1.bf16.msra.mxu0 %v2616_v24  ;;  %701 = vmatprep.subr.bf16.mxu1 %v2633_v27 }
  0x19   :  { %660 = vmatprep.subr.bf16.mxu0 %v2621_v25  ;;  %702 = vmatpush1.bf16.msra.mxu1 %v2649_v29 }
  0x1a   :  { %703 = vmatprep.subr.bf16.mxu1 %v2661_v31 }
  0x1c   :  { %661 = vmatpush1.bf16.msra.mxu0 %v2644_v28 }
  0x1d   :  { %662 = vmatprep.subr.bf16.mxu0 %v2656_v30  ;;  %704 = vmatpush1.bf16.msra.mxu1 %v2676_v34 }
  0x1e   :  { %1883 = vmatmul.mubr.msk.bf16.gmra.mrb[12].mxu0 %vm130_vm0, %v2129_v32  ;;  %1891 = vmatmul.mubr.msk.bf16.gmra.mrb[12].mxu1 %vm130_vm0, %v2129_v32 }
  0x1f   :  { %227 = vmatprep.mubr.bf16.mxu0 %v2456_v1  ;;  %340 = vmatprep.mubr.bf16.mxu1 %v2456_v1 }
  0x20   :  { %663 = vmatpush1.bf16.msra.mxu0 %v2669_v33  ;;  %705 = vmatprep.subr.bf16.mxu1 %v2688_v36 }
  0x21   :  { %664 = vmatprep.subr.bf16.mxu0 %v2683_v35  ;;  %706 = vmatpush1.bf16.msra.mxu1 %v2704_v38 }
  0x22   :  { %707 = vmatprep.subr.bf16.mxu1 %v2711_v39 }
  0x24   :  { %665 = vmatpush1.bf16.msra.mxu0 %v2699_v37 }
  0x25   :  { %802 = vmatprep.subr.bf16.mxu0 %v2508_v6  ;;  %708 = vmatpush1.bf16.msra.mxu1 %v2721_v41 }
  0x26   :  { %1884 = vmatmul.mubr.msk.bf16.gmra.mrb[16].mxu0 %vm130_vm0, %v2136_v40  ;;  %1892 = vmatmul.mubr.msk.bf16.gmra.mrb[16].mxu1 %vm130_vm0, %v2136_v40  ;;  %v2799_v40 = vrot.slane %v48_v49, %v60_v63 }
  0x27   :  { %237 = vmatprep.mubr.bf16.mxu0 %v2456_v1  ;;  %350 = vmatprep.mubr.bf16.mxu1 %v2456_v1 }
  0x28   :  { %845 = vmatprep.subr.bf16.mxu1 %v2533_v10 }
  0x2e   :  { %1885 = vmatmul.mubr.msk.bf16.gmra.mrb[20].mxu0 %vm130_vm0, %v2143_v42  ;;  %1893 = vmatmul.mubr.msk.bf16.gmra.mrb[20].mxu1 %vm130_vm0, %v2143_v42 }
  0x2f   :  { %247 = vmatprep.mubr.bf16.mxu0 %v2456_v1  ;;  %360 = vmatprep.mubr.bf16.mxu1 %v2456_v1 }
  0x36   :  { %1886 = vmatmul.mubr.msk.bf16.gmra.mrb[24].mxu0 %vm130_vm0, %v2150_v43  ;;  %1894 = vmatmul.mubr.msk.bf16.gmra.mrb[24].mxu1 %vm130_vm0, %v2150_v43 }
  0x37   :  { %257 = vmatprep.mubr.bf16.mxu0 %v2456_v1  ;;  %370 = vmatprep.mubr.bf16.mxu1 %v2456_v1 }
  0x3e   :  { %1887 = vmatmul.mubr.msk.bf16.gmra.mrb[28].mxu0 %vm130_vm0, %v2158_v44  ;;  %1895 = vmatmul.mubr.msk.bf16.gmra.mrb[28].mxu1 %vm130_vm0, %v2158_v44 }
  0x3f   :  { %682 = vmatprep.mubr.bf16.mxu0 %v2456_v1  ;;  %725 = vmatprep.mubr.bf16.mxu1 %v2456_v1 }
  0x46   :  { %683 = vmatmul.mubr.bf16.vlgmr.msra.gmra.mrb[0].mxu0 %v2457_v45  ;;  %726 = vmatmul.mubr.bf16.vlgmr.msra.gmra.mrb[0].mxu1 %v2457_v45 }
  0x47   :  { %803 = vmatpush1.bf16.msra.mxu0 %v2513_v7  ;;  %846 = vmatpush1.bf16.msra.mxu1 %v2549_v13 }
  0x48   :  { %804 = vmatprep.subr.bf16.mxu0 %v2519_v8  ;;  %847 = vmatprep.subr.bf16.mxu1 %v2554_v14 }
  0x49   :  { %834 = vmatprep.mubr.bf16.mxu0 %v2456_v1  ;;  %877 = vmatprep.mubr.bf16.mxu1 %v2456_v1 }
  0x4b   :  { %805 = vmatpush1.bf16.msra.mxu0 %v2526_v9  ;;  %848 = vmatpush1.bf16.msra.mxu1 %v2573_v17 }
  0x4c   :  { %806 = vmatprep.subr.bf16.mxu0 %v2544_v12  ;;  %849 = vmatprep.subr.bf16.mxu1 %v2580_v18 }
  0x4f   :  { %807 = vmatpush1.bf16.msra.mxu0 %v2562_v15  ;;  %850 = vmatpush1.bf16.msra.mxu1 %v2597_v21 }
  0x50   :  { %808 = vmatprep.subr.bf16.mxu0 %v2568_v16  ;;  %851 = vmatprep.subr.bf16.mxu1 %v2609_v23 }
  0x53   :  { %809 = vmatpush1.bf16.msra.mxu0 %v2592_v20  ;;  %852 = vmatpush1.bf16.msra.mxu1 %v2626_v26 }
  0x54   :  { %810 = vmatprep.subr.bf16.mxu0 %v2604_v22  ;;  %853 = vmatprep.subr.bf16.mxu1 %v2633_v27 }
  0x57   :  { %811 = vmatpush1.bf16.msra.mxu0 %v2616_v24  ;;  %854 = vmatpush1.bf16.msra.mxu1 %v2649_v29 }
  0x58   :  { %812 = vmatprep.subr.bf16.mxu0 %v2621_v25  ;;  %855 = vmatprep.subr.bf16.mxu1 %v2661_v31 }
  0x5b   :  { %813 = vmatpush1.bf16.msra.mxu0 %v2644_v28  ;;  %856 = vmatpush1.bf16.msra.mxu1 %v2676_v34 }
  0x5c   :  { %814 = vmatprep.subr.bf16.mxu0 %v2656_v30  ;;  %857 = vmatprep.subr.bf16.mxu1 %v2688_v36 }
  0x5f   :  { %815 = vmatpush1.bf16.msra.mxu0 %v2669_v33  ;;  %858 = vmatpush1.bf16.msra.mxu1 %v2704_v38 }
  0x60   :  { %816 = vmatprep.subr.bf16.mxu0 %v2683_v35  ;;  %859 = vmatprep.subr.bf16.mxu1 %v2711_v39 }
  0x63   :  { %817 = vmatpush1.bf16.msra.mxu0 %v2699_v37  ;;  %860 = vmatpush1.bf16.msra.mxu1 %v2721_v41 }
  0x64   :  { %954 = vmatprep.subr.bf16.mxu0 %v2508_v6  ;;  %997 = vmatprep.subr.bf16.mxu1 %v2533_v10 }
 0x119   :  { %v684_v53 = vpop.f32.mrb[0].mxu0  ;;  %v727_v54 = vpop.f32.mrb[0].mxu1 }
 0x11a   :  { %v1976_v56 = vadd.f32 %v684_v53, %v2789_v51  ;;  %v686_v57 = vpop.f32.mrb[1].mxu0  ;;  %v729_v58 = vpop.f32.mrb[1].mxu1  ;;  %v2008_v43 = vadd.f32 %v727_v54, %v2799_v40 }
 0x11b   :  { %v1977_v59 = vadd.f32 %v686_v57, %v2791_v52  ;;  %v688_v60 = vpop.f32.mrb[2].mxu0  ;;  %v731_v61 = vpop.f32.mrb[2].mxu1  ;;  %v2009_v42 = vadd.f32 %v729_v58, %v2796_v5 }
 0x11c   :  { %v1928_v62 = vmul.f32 -1.442695, %v1976_v56  ;;  %v1978_v0 = vadd.f32 %v688_v60, %v2789_v51  ;;  %v690_v2 = vpop.f32.mrb[3].mxu0  ;;  %v733_v3 = vpop.f32.mrb[3].mxu1  ;;  %v2010_v46 = vadd.f32 %v731_v61, %v2799_v40 }
 0x11d   :  { %v1930_v4 = vmul.f32 -1.442695, %v1977_v59  ;;  %v1979_v11 = vadd.f32 %v690_v2, %v2791_v52  ;;  %v1932_v44 = vmul.f32 -1.442695, %v2009_v42  ;;  %v2011_v45 = vadd.f32 %v733_v3, %v2796_v5 }
 0x11e   :  { %2168 = vpow2.f32 %v1928_v62  ;;  %v1929_v19 = vmul.f32 -1.442695, %v1978_v0 }
 0x11f   :  { %2170 = vpow2.f32 %v1930_v4  ;;  %v1931_v32 = vmul.f32 -1.442695, %v1979_v11  ;;  %v1933_v53 = vmul.f32 -1.442695, %v2011_v45 }
 0x120   :  { %2172 = vpow2.f32 %v1929_v19 }
 0x121   :  { %2174 = vpow2.f32 %v1931_v32 }
 0x122   :  { %2176 = vtanh.f32 %v2008_v43 }
 0x123   :  { %2178 = vpow2.f32 %v1932_v44 }
 0x124   :  { %2180 = vtanh.f32 %v2010_v46 }
 0x128   :  { %v2169_v47 = vpop.eup %2168 }
 0x129   :  { %v2171_v48 = vpop.eup %2170  ;;  %v750_v50 = vadd.f32 1.0, %v2169_v47 }
 0x12a   :  { %v762_v55 = vadd.f32 1.0, %v2171_v48  ;;  %v2173_v49 = vpop.eup %2172 }
 0x12b   :  { %2182 = vrcp.f32 %v750_v50  ;;  %v751_v56 = vadd.f32 1.0, %v2173_v49  ;;  %v2175_v57 = vpop.eup %2174 }
 0x12c   :  { %2184 = vrcp.f32 %v762_v55  ;;  %v763_v54 = vadd.f32 1.0, %v2175_v57  ;;  %v2177_v58 = vpop.eup %2176 }
 0x12d   :  { %2186 = vpow2.f32 %v1933_v53  ;;  %v2179_v59 = vpop.eup %2178 }
 0x12e   :  { %2188 = vrcp.f32 %v751_v56  ;;  %v2181_v60 = vpop.eup %2180  ;;  %v776_v4 = vadd.f32 1.0, %v2179_v59 }
 0x12f   :  { %2190 = vrcp.f32 %v763_v54 }
 0x130   :  { %2192 = vrcp.f32 %v776_v4 }
 0x135   :  { %v2183_v61 = vpop.eup %2182 }
 0x136   :  { %v2185_v62 = vpop.eup %2184  ;;  %v784_v63 = vmul.f32 %v2183_v61, %v2177_v58 }
 0x137   :  { %v2187_v0 = vpop.eup %2186  ;;  %v782_v2 = vmul.f32 0.0, %v2185_v62 }
 0x138   :  { %v2189_v3 = vpop.eup %2188  ;;  %v777_v42 = vadd.f32 1.0, %v2187_v0 }
 0x139   :  { %v2805_v11 = vadd.f32 %v784_v63, %v782_v2  ;;  %v785_v19 = vmul.f32 %v2189_v3, %v2181_v60  ;;  %v2191_v32 = vpop.eup %2190 }
 0x13a   :  { %v783_v43 = vmul.f32 0.0, %v2191_v32  ;;  %v2193_v45 = vpop.eup %2192 }
 0x13b   :  { %2194 = vtanh.f32 %v2805_v11 }
 0x13c   :  { %v2808_v44 = vadd.f32 %v785_v19, %v783_v43  ;;  %2196 = vrcp.f32 %v777_v42 }
 0x13e   :  { %2198 = vtanh.f32 %v2808_v44 }
 0x145   :  { %v2195_v46 = vpop.eup %2194 }
 0x146   :  { %v2197_v47 = vpop.eup %2196  ;;  %v790_v50 = vmul.f32 %v2195_v46, %v2193_v45 }
 0x148   :  { %v2199_v48 = vpop.eup %2198 }
 0x149   :  { %v791_v53 = vmul.f32 %v2199_v48, %v2197_v47 }
 0x14b   :  { %v801_v55 = vpack.c.bf16 %v791_v53, %v790_v50 }
 0x14d   :  { %835 = vmatmul.mubr.bf16.vlgmr.msra.gmra.mrb[4].mxu0 %v801_v55  ;;  %878 = vmatmul.mubr.bf16.vlgmr.msra.gmra.mrb[4].mxu1 %v801_v55 }
 0x14e   :  { %955 = vmatpush1.bf16.msra.mxu0 %v2513_v7  ;;  %998 = vmatpush1.bf16.msra.mxu1 %v2549_v13 }
 0x14f   :  { %956 = vmatprep.subr.bf16.mxu0 %v2519_v8  ;;  %999 = vmatprep.subr.bf16.mxu1 %v2554_v14 }
 0x150   :  { %986 = vmatprep.mubr.bf16.mxu0 %v2456_v1  ;;  %1029 = vmatprep.mubr.bf16.mxu1 %v2456_v1 }
 0x152   :  { %957 = vmatpush1.bf16.msra.mxu0 %v2526_v9  ;;  %1000 = vmatpush1.bf16.msra.mxu1 %v2573_v17 }
 0x153   :  { %958 = vmatprep.subr.bf16.mxu0 %v2544_v12  ;;  %1001 = vmatprep.subr.bf16.mxu1 %v2580_v18 }
 0x156   :  { %959 = vmatpush1.bf16.msra.mxu0 %v2562_v15  ;;  %1002 = vmatpush1.bf16.msra.mxu1 %v2597_v21 }
 0x157   :  { %960 = vmatprep.subr.bf16.mxu0 %v2568_v16  ;;  %1003 = vmatprep.subr.bf16.mxu1 %v2609_v23 }
 0x15a   :  { %961 = vmatpush1.bf16.msra.mxu0 %v2592_v20  ;;  %1004 = vmatpush1.bf16.msra.mxu1 %v2626_v26 }
 0x15b   :  { %962 = vmatprep.subr.bf16.mxu0 %v2604_v22  ;;  %1005 = vmatprep.subr.bf16.mxu1 %v2633_v27 }
 0x15e   :  { %963 = vmatpush1.bf16.msra.mxu0 %v2616_v24  ;;  %1006 = vmatpush1.bf16.msra.mxu1 %v2649_v29 }
 0x15f   :  { %964 = vmatprep.subr.bf16.mxu0 %v2621_v25  ;;  %1007 = vmatprep.subr.bf16.mxu1 %v2661_v31 }
 0x162   :  { %965 = vmatpush1.bf16.msra.mxu0 %v2644_v28  ;;  %1008 = vmatpush1.bf16.msra.mxu1 %v2676_v34 }
 0x163   :  { %966 = vmatprep.subr.bf16.mxu0 %v2656_v30  ;;  %1009 = vmatprep.subr.bf16.mxu1 %v2688_v36 }
 0x166   :  { %967 = vmatpush1.bf16.msra.mxu0 %v2669_v33  ;;  %1010 = vmatpush1.bf16.msra.mxu1 %v2704_v38 }
 0x167   :  { %968 = vmatprep.subr.bf16.mxu0 %v2683_v35  ;;  %1011 = vmatprep.subr.bf16.mxu1 %v2711_v39 }
 0x16a   :  { %969 = vmatpush1.bf16.msra.mxu0 %v2699_v37  ;;  %1012 = vmatpush1.bf16.msra.mxu1 %v2721_v41 }
 0x16b   :  { %1106 = vmatprep.subr.bf16.mxu0 %v2508_v6  ;;  %1149 = vmatprep.subr.bf16.mxu1 %v2533_v10 }
 0x220   :  { %v836_v49 = vpop.f32.mrb[4].mxu0  ;;  %v879_v56 = vpop.f32.mrb[4].mxu1 }
 0x221   :  { %v1980_v57 = vadd.f32 %v836_v49, %v2789_v51  ;;  %v838_v54 = vpop.f32.mrb[5].mxu0  ;;  %v881_v58 = vpop.f32.mrb[5].mxu1  ;;  %v2012_v43 = vadd.f32 %v879_v56, %v2799_v40 }
 0x222   :  { %v1981_v59 = vadd.f32 %v838_v54, %v2791_v52  ;;  %v840_v60 = vpop.f32.mrb[6].mxu0  ;;  %v883_v61 = vpop.f32.mrb[6].mxu1  ;;  %v2013_v42 = vadd.f32 %v881_v58, %v2796_v5 }
 0x223   :  { %v1934_v62 = vmul.f32 -1.442695, %v1980_v57  ;;  %v1982_v63 = vadd.f32 %v840_v60, %v2789_v51  ;;  %v842_v0 = vpop.f32.mrb[7].mxu0  ;;  %v885_v2 = vpop.f32.mrb[7].mxu1  ;;  %v2014_v47 = vadd.f32 %v883_v61, %v2799_v40 }
 0x224   :  { %v1936_v3 = vmul.f32 -1.442695, %v1981_v59  ;;  %v1983_v4 = vadd.f32 %v842_v0, %v2791_v52  ;;  %v1938_v45 = vmul.f32 -1.442695, %v2013_v42  ;;  %v2015_v46 = vadd.f32 %v885_v2, %v2796_v5 }
 0x225   :  { %2200 = vpow2.f32 %v1934_v62  ;;  %v1935_v19 = vmul.f32 -1.442695, %v1982_v63 }
 0x226   :  { %2202 = vpow2.f32 %v1936_v3  ;;  %v1937_v32 = vmul.f32 -1.442695, %v1983_v4  ;;  %v1939_v55 = vmul.f32 -1.442695, %v2015_v46 }
 0x227   :  { %2204 = vpow2.f32 %v1935_v19 }
 0x228   :  { %2206 = vpow2.f32 %v1937_v32 }
 0x229   :  { %2208 = vtanh.f32 %v2012_v43 }
 0x22a   :  { %2210 = vpow2.f32 %v1938_v45 }
 0x22b   :  { %2212 = vtanh.f32 %v2014_v47 }
 0x22f   :  { %v2201_v48 = vpop.eup %2200 }
 0x230   :  { %v2203_v50 = vpop.eup %2202  ;;  %v902_v53 = vadd.f32 1.0, %v2201_v48 }
 0x231   :  { %v914_v49 = vadd.f32 1.0, %v2203_v50  ;;  %v2205_v57 = vpop.eup %2204 }
 0x232   :  { %2214 = vrcp.f32 %v902_v53  ;;  %v903_v54 = vadd.f32 1.0, %v2205_v57  ;;  %v2207_v58 = vpop.eup %2206 }
 0x233   :  { %2216 = vrcp.f32 %v914_v49  ;;  %v915_v56 = vadd.f32 1.0, %v2207_v58  ;;  %v2209_v59 = vpop.eup %2208 }
 0x234   :  { %2218 = vpow2.f32 %v1939_v55  ;;  %v2211_v60 = vpop.eup %2210 }
 0x235   :  { %2220 = vrcp.f32 %v903_v54  ;;  %v2213_v61 = vpop.eup %2212  ;;  %v928_v19 = vadd.f32 1.0, %v2211_v60 }
 0x236   :  { %2222 = vrcp.f32 %v915_v56 }
 0x237   :  { %2224 = vrcp.f32 %v928_v19 }
 0x23c   :  { %v2215_v62 = vpop.eup %2214 }
 0x23d   :  { %v2217_v63 = vpop.eup %2216  ;;  %v936_v0 = vmul.f32 %v2215_v62, %v2209_v59 }
 0x23e   :  { %v2219_v2 = vpop.eup %2218  ;;  %v934_v3 = vmul.f32 %v2217_v63, %v2805_v11 }
 0x23f   :  { %v2221_v4 = vpop.eup %2220  ;;  %v929_v45 = vadd.f32 1.0, %v2219_v2 }
 0x240   :  { %v2854_v32 = vadd.f32 %v936_v0, %v934_v3  ;;  %v937_v42 = vmul.f32 %v2221_v4, %v2213_v61  ;;  %v2223_v43 = vpop.eup %2222 }
 0x241   :  { %v935_v46 = vmul.f32 %v2223_v43, %v2808_v44  ;;  %v2225_v48 = vpop.eup %2224 }
 0x242   :  { %2226 = vtanh.f32 %v2854_v32 }
 0x243   :  { %v2858_v47 = vadd.f32 %v937_v42, %v935_v46  ;;  %2228 = vrcp.f32 %v929_v45 }
 0x245   :  { %2230 = vtanh.f32 %v2858_v47 }
 0x24c   :  { %v2227_v50 = vpop.eup %2226 }
 0x24d   :  { %v2229_v11 = vpop.eup %2228  ;;  %v942_v55 = vmul.f32 %v2227_v50, %v2225_v48 }
 0x24f   :  { %v2231_v53 = vpop.eup %2230 }
 0x250   :  { %v943_v49 = vmul.f32 %v2231_v53, %v2229_v11 }
 0x252   :  { %v953_v57 = vpack.c.bf16 %v943_v49, %v942_v55 }
 0x254   :  { %987 = vmatmul.mubr.bf16.vlgmr.msra.gmra.mrb[8].mxu0 %v953_v57  ;;  %1030 = vmatmul.mubr.bf16.vlgmr.msra.gmra.mrb[8].mxu1 %v953_v57 }
 0x255   :  { %1107 = vmatpush1.bf16.msra.mxu0 %v2513_v7  ;;  %1150 = vmatpush1.bf16.msra.mxu1 %v2549_v13 }
 0x256   :  { %1108 = vmatprep.subr.bf16.mxu0 %v2519_v8  ;;  %1151 = vmatprep.subr.bf16.mxu1 %v2554_v14 }
 0x257   :  { %1138 = vmatprep.mubr.bf16.mxu0 %v2456_v1  ;;  %1181 = vmatprep.mubr.bf16.mxu1 %v2456_v1 }
 0x259   :  { %1109 = vmatpush1.bf16.msra.mxu0 %v2526_v9  ;;  %1152 = vmatpush1.bf16.msra.mxu1 %v2573_v17 }
 0x25a   :  { %1110 = vmatprep.subr.bf16.mxu0 %v2544_v12  ;;  %1153 = vmatprep.subr.bf16.mxu1 %v2580_v18 }
 0x25d   :  { %1111 = vmatpush1.bf16.msra.mxu0 %v2562_v15  ;;  %1154 = vmatpush1.bf16.msra.mxu1 %v2597_v21 }
 0x25e   :  { %1112 = vmatprep.subr.bf16.mxu0 %v2568_v16  ;;  %1155 = vmatprep.subr.bf16.mxu1 %v2609_v23 }
 0x261   :  { %1113 = vmatpush1.bf16.msra.mxu0 %v2592_v20  ;;  %1156 = vmatpush1.bf16.msra.mxu1 %v2626_v26 }
 0x262   :  { %1114 = vmatprep.subr.bf16.mxu0 %v2604_v22  ;;  %1157 = vmatprep.subr.bf16.mxu1 %v2633_v27 }
 0x265   :  { %1115 = vmatpush1.bf16.msra.mxu0 %v2616_v24  ;;  %1158 = vmatpush1.bf16.msra.mxu1 %v2649_v29 }
 0x266   :  { %1116 = vmatprep.subr.bf16.mxu0 %v2621_v25  ;;  %1159 = vmatprep.subr.bf16.mxu1 %v2661_v31 }
 0x269   :  { %1117 = vmatpush1.bf16.msra.mxu0 %v2644_v28  ;;  %1160 = vmatpush1.bf16.msra.mxu1 %v2676_v34 }
 0x26a   :  { %1118 = vmatprep.subr.bf16.mxu0 %v2656_v30  ;;  %1161 = vmatprep.subr.bf16.mxu1 %v2688_v36 }
 0x26d   :  { %1119 = vmatpush1.bf16.msra.mxu0 %v2669_v33  ;;  %1162 = vmatpush1.bf16.msra.mxu1 %v2704_v38 }
 0x26e   :  { %1120 = vmatprep.subr.bf16.mxu0 %v2683_v35  ;;  %1163 = vmatprep.subr.bf16.mxu1 %v2711_v39 }
 0x271   :  { %1121 = vmatpush1.bf16.msra.mxu0 %v2699_v37  ;;  %1164 = vmatpush1.bf16.msra.mxu1 %v2721_v41 }
 0x272   :  { %1258 = vmatprep.subr.bf16.mxu0 %v2508_v6  ;;  %1301 = vmatprep.subr.bf16.mxu1 %v2533_v10 }
 0x327   :  { %v988_v44 = vpop.f32.mrb[8].mxu0  ;;  %v1031_v54 = vpop.f32.mrb[8].mxu1 }
 0x328   :  { %v1984_v58 = vadd.f32 %v988_v44, %v2789_v51  ;;  %v990_v56 = vpop.f32.mrb[9].mxu0  ;;  %v1033_v59 = vpop.f32.mrb[9].mxu1  ;;  %v2016_v45 = vadd.f32 %v1031_v54, %v2799_v40 }
 0x329   :  { %v1985_v60 = vadd.f32 %v990_v56, %v2791_v52  ;;  %v992_v61 = vpop.f32.mrb[10].mxu0  ;;  %v1035_v62 = vpop.f32.mrb[10].mxu1  ;;  %v2017_v43 = vadd.f32 %v1033_v59, %v2796_v5 }
 0x32a   :  { %v1940_v63 = vmul.f32 -1.442695, %v1984_v58  ;;  %v1986_v0 = vadd.f32 %v992_v61, %v2789_v51  ;;  %v994_v2 = vpop.f32.mrb[11].mxu0  ;;  %v1037_v3 = vpop.f32.mrb[11].mxu1  ;;  %v2018_v50 = vadd.f32 %v1035_v62, %v2799_v40 }
 0x32b   :  { %v1942_v4 = vmul.f32 -1.442695, %v1985_v60  ;;  %v1987_v6 = vadd.f32 %v994_v2, %v2791_v52  ;;  %v1944_v46 = vmul.f32 -1.442695, %v2017_v43  ;;  %v2019_v48 = vadd.f32 %v1037_v3, %v2796_v5 }
 0x32c   :  { %2232 = vpow2.f32 %v1940_v63  ;;  %v1941_v19 = vmul.f32 -1.442695, %v1986_v0 }
 0x32d   :  { %2234 = vpow2.f32 %v1942_v4  ;;  %v1943_v42 = vmul.f32 -1.442695, %v1987_v6  ;;  %v1945_v49 = vmul.f32 -1.442695, %v2019_v48 }
 0x32e   :  { %2236 = vpow2.f32 %v1941_v19 }
 0x32f   :  { %2238 = vpow2.f32 %v1943_v42 }
 0x330   :  { %2240 = vtanh.f32 %v2016_v45 }
 0x331   :  { %2242 = vpow2.f32 %v1944_v46 }
 0x332   :  { %2244 = vtanh.f32 %v2018_v50 }
 0x336   :  { %v2233_v11 = vpop.eup %2232 }
 0x337   :  { %v2235_v53 = vpop.eup %2234  ;;  %v1054_v55 = vadd.f32 1.0, %v2233_v11 }
 0x338   :  { %v1066_v57 = vadd.f32 1.0, %v2235_v53  ;;  %v2237_v44 = vpop.eup %2236 }
 0x339   :  { %2246 = vrcp.f32 %v1054_v55  ;;  %v1055_v58 = vadd.f32 1.0, %v2237_v44  ;;  %v2239_v56 = vpop.eup %2238 }
 0x33a   :  { %2248 = vrcp.f32 %v1066_v57  ;;  %v1067_v54 = vadd.f32 1.0, %v2239_v56  ;;  %v2241_v59 = vpop.eup %2240 }
 0x33b   :  { %2250 = vpow2.f32 %v1945_v49  ;;  %v2243_v60 = vpop.eup %2242 }
 0x33c   :  { %2252 = vrcp.f32 %v1055_v58  ;;  %v2245_v61 = vpop.eup %2244  ;;  %v1080_v6 = vadd.f32 1.0, %v2243_v60 }
 0x33d   :  { %2254 = vrcp.f32 %v1067_v54 }
 0x33e   :  { %2256 = vrcp.f32 %v1080_v6 }
 0x343   :  { %v2247_v62 = vpop.eup %2246 }
 0x344   :  { %v2249_v63 = vpop.eup %2248  ;;  %v1088_v0 = vmul.f32 %v2247_v62, %v2241_v59 }
 0x345   :  { %v2251_v2 = vpop.eup %2250  ;;  %v1086_v3 = vmul.f32 %v2249_v63, %v2854_v32 }
 0x346   :  { %v2253_v4 = vpop.eup %2252  ;;  %v1081_v45 = vadd.f32 1.0, %v2251_v2 }
 0x347   :  { %v2904_v19 = vadd.f32 %v1088_v0, %v1086_v3  ;;  %v1089_v42 = vmul.f32 %v2253_v4, %v2245_v61  ;;  %v2255_v43 = vpop.eup %2254 }
 0x348   :  { %v1087_v46 = vmul.f32 %v2255_v43, %v2858_v47  ;;  %v2257_v50 = vpop.eup %2256 }
 0x349   :  { %2258 = vtanh.f32 %v2904_v19 }
 0x34a   :  { %v2908_v48 = vadd.f32 %v1089_v42, %v1087_v46  ;;  %2260 = vrcp.f32 %v1081_v45 }
 0x34c   :  { %2262 = vtanh.f32 %v2908_v48 }
 0x353   :  { %v2259_v11 = vpop.eup %2258 }
 0x354   :  { %v2261_v32 = vpop.eup %2260  ;;  %v1094_v55 = vmul.f32 %v2259_v11, %v2257_v50 }
 0x356   :  { %v2263_v53 = vpop.eup %2262 }
 0x357   :  { %v1095_v49 = vmul.f32 %v2263_v53, %v2261_v32 }
 0x359   :  { %v1105_v57 = vpack.c.bf16 %v1095_v49, %v1094_v55 }
 0x35b   :  { %1139 = vmatmul.mubr.bf16.vlgmr.msra.gmra.mrb[12].mxu0 %v1105_v57  ;;  %1182 = vmatmul.mubr.bf16.vlgmr.msra.gmra.mrb[12].mxu1 %v1105_v57 }
 0x35c   :  { %1259 = vmatpush1.bf16.msra.mxu0 %v2513_v7  ;;  %1302 = vmatpush1.bf16.msra.mxu1 %v2549_v13  ;;  %v2946_v7 = vld [vmem:[%s3293_s3 + $0x4] ss:$16 sps:$4 sm:$0xff]  }
 0x35d   :  { %1260 = vmatprep.subr.bf16.mxu0 %v2519_v8  ;;  %1303 = vmatprep.subr.bf16.mxu1 %v2554_v14 }
 0x35e   :  { %1290 = vmatprep.mubr.bf16.mxu0 %v2456_v1  ;;  %1333 = vmatprep.mubr.bf16.mxu1 %v2456_v1 }
 0x360   :  { %1261 = vmatpush1.bf16.msra.mxu0 %v2526_v9  ;;  %1304 = vmatpush1.bf16.msra.mxu1 %v2573_v17 }
 0x361   :  { %1262 = vmatprep.subr.bf16.mxu0 %v2544_v12  ;;  %1305 = vmatprep.subr.bf16.mxu1 %v2580_v18 }
 0x364   :  { %1263 = vmatpush1.bf16.msra.mxu0 %v2562_v15  ;;  %1306 = vmatpush1.bf16.msra.mxu1 %v2597_v21 }
 0x365   :  { %1264 = vmatprep.subr.bf16.mxu0 %v2568_v16  ;;  %1307 = vmatprep.subr.bf16.mxu1 %v2609_v23 }
 0x368   :  { %1265 = vmatpush1.bf16.msra.mxu0 %v2592_v20  ;;  %1308 = vmatpush1.bf16.msra.mxu1 %v2626_v26 }
 0x369   :  { %1266 = vmatprep.subr.bf16.mxu0 %v2604_v22  ;;  %1309 = vmatprep.subr.bf16.mxu1 %v2633_v27 }
 0x36c   :  { %1267 = vmatpush1.bf16.msra.mxu0 %v2616_v24  ;;  %1310 = vmatpush1.bf16.msra.mxu1 %v2649_v29 }
 0x36d   :  { %1268 = vmatprep.subr.bf16.mxu0 %v2621_v25  ;;  %1311 = vmatprep.subr.bf16.mxu1 %v2661_v31 }
 0x370   :  { %1269 = vmatpush1.bf16.msra.mxu0 %v2644_v28  ;;  %1312 = vmatpush1.bf16.msra.mxu1 %v2676_v34 }
 0x371   :  { %1270 = vmatprep.subr.bf16.mxu0 %v2656_v30  ;;  %1313 = vmatprep.subr.bf16.mxu1 %v2688_v36 }
 0x374   :  { %1271 = vmatpush1.bf16.msra.mxu0 %v2669_v33  ;;  %1314 = vmatpush1.bf16.msra.mxu1 %v2704_v38 }
 0x375   :  { %1272 = vmatprep.subr.bf16.mxu0 %v2683_v35  ;;  %1315 = vmatprep.subr.bf16.mxu1 %v2711_v39 }
 0x378   :  { %1273 = vmatpush1.bf16.msra.mxu0 %v2699_v37  ;;  %1316 = vmatpush1.bf16.msra.mxu1 %v2721_v41 }
 0x379   :  { %1410 = vmatprep.subr.bf16.mxu0 %v2946_v7  ;;  %1453 = vmatprep.subr.bf16.mxu1 %v2533_v10 }
 0x42e   :  { %v1140_v8 = vpop.f32.mrb[12].mxu0  ;;  %v1183_v9 = vpop.f32.mrb[12].mxu1 }
 0x42f   :  { %v1988_v12 = vadd.f32 %v1140_v8, %v2789_v51  ;;  %v1142_v13 = vpop.f32.mrb[13].mxu0  ;;  %v1185_v14 = vpop.f32.mrb[13].mxu1  ;;  %v2020_v27 = vadd.f32 %v1183_v9, %v2799_v40 }
 0x430   :  { %v1989_v15 = vadd.f32 %v1142_v13, %v2791_v52  ;;  %v1144_v16 = vpop.f32.mrb[14].mxu0  ;;  %v1187_v17 = vpop.f32.mrb[14].mxu1  ;;  %v2021_v26 = vadd.f32 %v1185_v14, %v2796_v5  ;;  %v2975_v13 = vld [vmem:[%s3293_s3 + $0x8] ss:$16 sps:$4 sm:$0xff]   ;;  %v2981_v14 = vld [vmem:[%s3293_s3 + $0x24] ss:$16 sps:$4 sm:$0xff]  }
 0x431   :  { %v1946_v18 = vmul.f32 -1.442695, %v1988_v12  ;;  %v1990_v20 = vadd.f32 %v1144_v16, %v2789_v51  ;;  %v1146_v21 = vpop.f32.mrb[15].mxu0  ;;  %v1189_v22 = vpop.f32.mrb[15].mxu1  ;;  %v2022_v30 = vadd.f32 %v1187_v17, %v2799_v40  ;;  %v2995_v16 = vld [vmem:[%s3293_s3 + $0x20] ss:$16 sps:$4 sm:$0xff]  }
 0x432   :  { %v1948_v23 = vmul.f32 -1.442695, %v1989_v15  ;;  %v1991_v24 = vadd.f32 %v1146_v21, %v2791_v52  ;;  %v1950_v28 = vmul.f32 -1.442695, %v2021_v26  ;;  %v2023_v29 = vadd.f32 %v1189_v22, %v2796_v5  ;;  %v2987_v15 = vld [vmem:[%s3293_s3 + $0x2c] ss:$16 sps:$4 sm:$0xff]  }
 0x433   :  { %2264 = vpow2.f32 %v1946_v18  ;;  %v1947_v10 = vmul.f32 -1.442695, %v1990_v20  ;;  %v3001_v17 = vld [vmem:[%s3293_s3 + $0x28] ss:$16 sps:$4 sm:$0xff]   ;;  %v3007_v18 = vld [vmem:[%s3293_s3 + $0x44] ss:$16 sps:$4 sm:$0xff]  }
 0x434   :  { %2266 = vpow2.f32 %v1948_v23  ;;  %v1949_v25 = vmul.f32 -1.442695, %v1991_v24  ;;  %v1951_v44 = vmul.f32 -1.442695, %v2023_v29  ;;  %v3013_v20 = vld [vmem:[%s3293_s3 + $0x4c] ss:$16 sps:$4 sm:$0xff]  }
 0x435   :  { %2268 = vpow2.f32 %v1947_v10  ;;  %v3019_v21 = vld [vmem:[%s3293_s3 + $0x40] ss:$16 sps:$4 sm:$0xff]   ;;  %v3025_v22 = vld [vmem:[%s3293_s3 + $0x48] ss:$16 sps:$4 sm:$0xff]   ;;  %v3031_v23 = vld [vmem:[%s3293_s3 + $0x64] ss:$16 sps:$4 sm:$0xff]  }
 0x436   :  { %2270 = vpow2.f32 %v1949_v25  ;;  %v3037_v24 = vld [vmem:[%s3293_s3 + $0x6c] ss:$16 sps:$4 sm:$0xff]   ;;  %v3043_v10 = vld [vmem:[%s3293_s3 + $0x60] ss:$16 sps:$4 sm:$0xff]   ;;  %v3049_v25 = vld [vmem:[%s3293_s3 + $0x68] ss:$16 sps:$4 sm:$0xff]  }
 0x437   :  { %2272 = vtanh.f32 %v2020_v27  ;;  %v3055_v26 = vld [vmem:[%s3293_s3 + $0x84] ss:$16 sps:$4 sm:$0xff]   ;;  %v3061_v27 = vld [vmem:[%s3293_s3 + $0x8c] ss:$16 sps:$4 sm:$0xff]   ;;  %v3073_v29 = vld [vmem:[%s3293_s3 + $0x88] ss:$16 sps:$4 sm:$0xff]  }
 0x438   :  { %2274 = vpow2.f32 %v1950_v28  ;;  %v3067_v28 = vld [vmem:[%s3293_s3 + $0x80] ss:$16 sps:$4 sm:$0xff]  }
 0x439   :  { %2276 = vtanh.f32 %v2022_v30  ;;  %v3079_v30 = vld [vmem:[%s3293_s3 + $0xa4] ss:$16 sps:$4 sm:$0xff]  }
 0x43d   :  { %v2265_v31 = vpop.eup %2264 }
 0x43e   :  { %v2267_v33 = vpop.eup %2266  ;;  %v1206_v47 = vadd.f32 1.0, %v2265_v31  ;;  %v3085_v31 = vld [vmem:[%s3293_s3 + $0xac] ss:$16 sps:$4 sm:$0xff]  }
 0x43f   :  { %v1218_v58 = vadd.f32 1.0, %v2267_v33  ;;  %v2269_v56 = vpop.eup %2268  ;;  %v3091_v33 = vld [vmem:[%s3293_s3 + $0xa0] ss:$16 sps:$4 sm:$0xff]  }
 0x440   :  { %2278 = vrcp.f32 %v1206_v47  ;;  %v1207_v54 = vadd.f32 1.0, %v2269_v56  ;;  %v2271_v59 = vpop.eup %2270  ;;  %v3098_v47 = vld [vmem:[%s3293_s3 + $0xc4] ss:$16 sps:$4 sm:$0xff]  }
 0x441   :  { %2280 = vrcp.f32 %v1218_v58  ;;  %v1219_v60 = vadd.f32 1.0, %v2271_v59  ;;  %v2273_v61 = vpop.eup %2272 }
 0x442   :  { %2282 = vpow2.f32 %v1951_v44  ;;  %v2275_v62 = vpop.eup %2274  ;;  %v3105_v44 = vld [vmem:[%s3293_s3 + $0xc0] ss:$16 sps:$4 sm:$0xff]  }
 0x443   :  { %2284 = vrcp.f32 %v1207_v54  ;;  %v2277_v63 = vpop.eup %2276  ;;  %v1232_v43 = vadd.f32 1.0, %v2275_v62 }
 0x444   :  { %2286 = vrcp.f32 %v1219_v60 }
 0x445   :  { %2288 = vrcp.f32 %v1232_v43 }
 0x44a   :  { %v2279_v0 = vpop.eup %2278 }
 0x44b   :  { %v2281_v2 = vpop.eup %2280  ;;  %v1240_v3 = vmul.f32 %v2279_v0, %v2273_v61 }
 0x44c   :  { %v2283_v4 = vpop.eup %2282  ;;  %v1238_v6 = vmul.f32 %v2281_v2, %v2904_v19 }
 0x44d   :  { %v2285_v42 = vpop.eup %2284  ;;  %v1233_v11 = vadd.f32 1.0, %v2283_v4 }
 0x44e   :  { %v2959_v45 = vadd.f32 %v1240_v3, %v1238_v6  ;;  %v1241_v46 = vmul.f32 %v2285_v42, %v2277_v63  ;;  %v2287_v50 = vpop.eup %2286 }
 0x44f   :  { %v1239_v32 = vmul.f32 %v2287_v50, %v2908_v48  ;;  %v2289_v55 = vpop.eup %2288  ;;  %v2969_v48 = vld [vmem:[%s3293_s3] ss:$16 sps:$4 sm:$0xff]  }
 0x450   :  { %2290 = vtanh.f32 %v2959_v45 }
 0x451   :  { %v2963_v53 = vadd.f32 %v1241_v46, %v1239_v32  ;;  %2292 = vrcp.f32 %v1233_v11 }
 0x453   :  { %2294 = vtanh.f32 %v2963_v53 }
 0x45a   :  { %v2291_v49 = vpop.eup %2290 }
 0x45b   :  { %v2293_v19 = vpop.eup %2292  ;;  %v1246_v8 = vmul.f32 %v2291_v49, %v2289_v55 }
 0x45d   :  { %v2295_v57 = vpop.eup %2294 }
 0x45e   :  { %v1247_v9 = vmul.f32 %v2295_v57, %v2293_v19 }
 0x460   :  { %v1257_v12 = vpack.c.bf16 %v1247_v9, %v1246_v8 }
 0x462   :  { %1291 = vmatmul.mubr.bf16.vlgmr.msra.gmra.mrb[16].mxu0 %v1257_v12  ;;  %1334 = vmatmul.mubr.bf16.vlgmr.msra.gmra.mrb[16].mxu1 %v1257_v12 }
 0x463   :  { %1411 = vmatpush1.bf16.msra.mxu0 %v2969_v48  ;;  %1454 = vmatpush1.bf16.msra.mxu1 %v2975_v13 }
 0x464   :  { %1412 = vmatprep.subr.bf16.mxu0 %v2981_v14  ;;  %1455 = vmatprep.subr.bf16.mxu1 %v2987_v15 }
 0x465   :  { %1442 = vmatprep.mubr.bf16.mxu0 %v2456_v1  ;;  %1485 = vmatprep.mubr.bf16.mxu1 %v2456_v1 }
 0x467   :  { %1413 = vmatpush1.bf16.msra.mxu0 %v2995_v16  ;;  %1456 = vmatpush1.bf16.msra.mxu1 %v3001_v17 }
 0x468   :  { %1414 = vmatprep.subr.bf16.mxu0 %v3007_v18  ;;  %1457 = vmatprep.subr.bf16.mxu1 %v3013_v20 }
 0x46b   :  { %1415 = vmatpush1.bf16.msra.mxu0 %v3019_v21  ;;  %1458 = vmatpush1.bf16.msra.mxu1 %v3025_v22 }
 0x46c   :  { %1416 = vmatprep.subr.bf16.mxu0 %v3031_v23  ;;  %1459 = vmatprep.subr.bf16.mxu1 %v3037_v24 }
 0x46f   :  { %1417 = vmatpush1.bf16.msra.mxu0 %v3043_v10  ;;  %1460 = vmatpush1.bf16.msra.mxu1 %v3049_v25 }
 0x470   :  { %1418 = vmatprep.subr.bf16.mxu0 %v3055_v26  ;;  %1461 = vmatprep.subr.bf16.mxu1 %v3061_v27 }
 0x473   :  { %1419 = vmatpush1.bf16.msra.mxu0 %v3067_v28  ;;  %1462 = vmatpush1.bf16.msra.mxu1 %v3073_v29 }
 0x474   :  { %1420 = vmatprep.subr.bf16.mxu0 %v3079_v30  ;;  %1463 = vmatprep.subr.bf16.mxu1 %v3085_v31 }
 0x477   :  { %1421 = vmatpush1.bf16.msra.mxu0 %v3091_v33  ;;  %1464 = vmatpush1.bf16.msra.mxu1 %v2676_v34  ;;  %v3117_v34 = vld [vmem:[%s3293_s3 + $0xc] ss:$16 sps:$4 sm:$0xff]  }
 0x478   :  { %1422 = vmatprep.subr.bf16.mxu0 %v3098_v47  ;;  %1465 = vmatprep.subr.bf16.mxu1 %v2688_v36 }
 0x47b   :  { %1423 = vmatpush1.bf16.msra.mxu0 %v3105_v44  ;;  %1466 = vmatpush1.bf16.msra.mxu1 %v2704_v38 }
 0x47c   :  { %1424 = vmatprep.subr.bf16.mxu0 %v2683_v35  ;;  %1467 = vmatprep.subr.bf16.mxu1 %v2711_v39 }
 0x47f   :  { %1425 = vmatpush1.bf16.msra.mxu0 %v2699_v37  ;;  %1468 = vmatpush1.bf16.msra.mxu1 %v2721_v41 }
 0x480   :  { %1562 = vmatprep.subr.bf16.mxu0 %v2946_v7  ;;  %1605 = vmatprep.subr.bf16.mxu1 %v3117_v34 }
 0x535   :  { %v1292_v36 = vpop.f32.mrb[16].mxu0  ;;  %v1335_v58 = vpop.f32.mrb[16].mxu1 }
 0x536   :  { %v1992_v38 = vadd.f32 %v1292_v36, %v2789_v51  ;;  %v1294_v35 = vpop.f32.mrb[17].mxu0  ;;  %v1337_v56 = vpop.f32.mrb[17].mxu1  ;;  %v2024_v4 = vadd.f32 %v1335_v58, %v2799_v40 }
 0x537   :  { %v1993_v39 = vadd.f32 %v1294_v35, %v2791_v52  ;;  %v1296_v37 = vpop.f32.mrb[18].mxu0  ;;  %v1339_v54 = vpop.f32.mrb[18].mxu1  ;;  %v2025_v3 = vadd.f32 %v1337_v56, %v2796_v5 }
 0x538   :  { %v1952_v41 = vmul.f32 -1.442695, %v1992_v38  ;;  %v1994_v59 = vadd.f32 %v1296_v37, %v2789_v51  ;;  %v1298_v60 = vpop.f32.mrb[19].mxu0  ;;  %v1341_v61 = vpop.f32.mrb[19].mxu1  ;;  %v2026_v43 = vadd.f32 %v1339_v54, %v2799_v40 }
 0x539   :  { %v1954_v62 = vmul.f32 -1.442695, %v1993_v39  ;;  %v1995_v63 = vadd.f32 %v1298_v60, %v2791_v52  ;;  %v1956_v6 = vmul.f32 -1.442695, %v2025_v3  ;;  %v2027_v42 = vadd.f32 %v1341_v61, %v2796_v5 }
 0x53a   :  { %2296 = vpow2.f32 %v1952_v41  ;;  %v1953_v0 = vmul.f32 -1.442695, %v1994_v59 }
 0x53b   :  { %2298 = vpow2.f32 %v1954_v62  ;;  %v1955_v2 = vmul.f32 -1.442695, %v1995_v63  ;;  %v1957_v32 = vmul.f32 -1.442695, %v2027_v42 }
 0x53c   :  { %2300 = vpow2.f32 %v1953_v0 }
 0x53d   :  { %2302 = vpow2.f32 %v1955_v2 }
 0x53e   :  { %2304 = vtanh.f32 %v2024_v4 }
 0x53f   :  { %2306 = vpow2.f32 %v1956_v6 }
 0x540   :  { %2308 = vtanh.f32 %v2026_v43  ;;  %v3169_v43 = vld [vmem:[%s3293_s3 + $0xcc] ss:$16 sps:$4 sm:$0xff]  }
 0x544   :  { %v2297_v46 = vpop.eup %2296 }
 0x545   :  { %v2299_v50 = vpop.eup %2298  ;;  %v1358_v11 = vadd.f32 1.0, %v2297_v46  ;;  %v3176_v46 = vld [vmem:[%s3293_s3 + $0xc8] ss:$16 sps:$4 sm:$0xff]  }
 0x546   :  { %v1370_v55 = vadd.f32 1.0, %v2299_v50  ;;  %v2301_v49 = vpop.eup %2300  ;;  %v3182_v50 = vld [vmem:[%s3293_s3 + $0xe4] ss:$16 sps:$4 sm:$0xff]  }
 0x547   :  { %2310 = vrcp.f32 %v1358_v11  ;;  %v1359_v19 = vadd.f32 1.0, %v2301_v49  ;;  %v2303_v57 = vpop.eup %2302  ;;  %v3188_v11 = vld [vmem:[%s3293_s3 + $0xec] ss:$16 sps:$4 sm:$0xff]  }
 0x548   :  { %2312 = vrcp.f32 %v1370_v55  ;;  %v1371_v8 = vadd.f32 1.0, %v2303_v57  ;;  %v2305_v9 = vpop.eup %2304  ;;  %v3200_v55 = vld [vmem:[%s3293_s3 + $0xe8] ss:$16 sps:$4 sm:$0xff]  }
 0x549   :  { %2314 = vpow2.f32 %v1957_v32  ;;  %v2307_v12 = vpop.eup %2306  ;;  %v3194_v32 = vld [vmem:[%s3293_s3 + $0xe0] ss:$16 sps:$4 sm:$0xff]  }
 0x54a   :  { %2316 = vrcp.f32 %v1359_v19  ;;  %v2309_v36 = vpop.eup %2308  ;;  %v1384_v54 = vadd.f32 1.0, %v2307_v12 }
 0x54b   :  { %2318 = vrcp.f32 %v1371_v8 }
 0x54c   :  { %2320 = vrcp.f32 %v1384_v54 }
 0x551   :  { %v2311_v58 = vpop.eup %2310 }
 0x552   :  { %v2313_v38 = vpop.eup %2312  ;;  %v1392_v35 = vmul.f32 %v2311_v58, %v2305_v9 }
 0x553   :  { %v2315_v56 = vpop.eup %2314  ;;  %v1390_v39 = vmul.f32 %v2313_v38, %v2959_v45 }
 0x554   :  { %v2317_v37 = vpop.eup %2316  ;;  %v1385_v61 = vadd.f32 1.0, %v2315_v56 }
 0x555   :  { %v3129_v41 = vadd.f32 %v1392_v35, %v1390_v39  ;;  %v1393_v59 = vmul.f32 %v2317_v37, %v2309_v36  ;;  %v2319_v60 = vpop.eup %2318 }
 0x556   :  { %v1391_v62 = vmul.f32 %v2319_v60, %v2963_v53  ;;  %v2321_v0 = vpop.eup %2320  ;;  %v3162_v53 = vld [vmem:[%s3293_s3 + $0xa8] ss:$16 sps:$4 sm:$0xff]  }
 0x557   :  { %2322 = vtanh.f32 %v3129_v41 }
 0x558   :  { %v3133_v63 = vadd.f32 %v1393_v59, %v1391_v62  ;;  %2324 = vrcp.f32 %v1385_v61 }
 0x55a   :  { %2326 = vtanh.f32 %v3133_v63 }
 0x561   :  { %v2323_v2 = vpop.eup %2322 }
 0x562   :  { %v2325_v45 = vpop.eup %2324  ;;  %v1398_v4 = vmul.f32 %v2323_v2, %v2321_v0 }
 0x564   :  { %v2327_v3 = vpop.eup %2326 }
 0x565   :  { %v1399_v6 = vmul.f32 %v2327_v3, %v2325_v45 }
 0x567   :  { %v1409_v42 = vpack.c.bf16 %v1399_v6, %v1398_v4 }
 0x569   :  { %1443 = vmatmul.mubr.bf16.vlgmr.msra.gmra.mrb[20].mxu0 %v1409_v42  ;;  %1486 = vmatmul.mubr.bf16.vlgmr.msra.gmra.mrb[20].mxu1 %v1409_v42 }
 0x56a   :  { %1563 = vmatpush1.bf16.msra.mxu0 %v2969_v48  ;;  %1606 = vmatpush1.bf16.msra.mxu1 %v2975_v13 }
 0x56b   :  { %1564 = vmatprep.subr.bf16.mxu0 %v2981_v14  ;;  %1607 = vmatprep.subr.bf16.mxu1 %v2987_v15 }
 0x56c   :  { %1594 = vmatprep.mubr.bf16.mxu0 %v2456_v1  ;;  %1637 = vmatprep.mubr.bf16.mxu1 %v2456_v1 }
 0x56e   :  { %1565 = vmatpush1.bf16.msra.mxu0 %v2995_v16  ;;  %1608 = vmatpush1.bf16.msra.mxu1 %v3001_v17 }
 0x56f   :  { %1566 = vmatprep.subr.bf16.mxu0 %v3007_v18  ;;  %1609 = vmatprep.subr.bf16.mxu1 %v3013_v20 }
 0x572   :  { %1567 = vmatpush1.bf16.msra.mxu0 %v3019_v21  ;;  %1610 = vmatpush1.bf16.msra.mxu1 %v3025_v22 }
 0x573   :  { %1568 = vmatprep.subr.bf16.mxu0 %v3031_v23  ;;  %1611 = vmatprep.subr.bf16.mxu1 %v3037_v24 }
 0x576   :  { %1569 = vmatpush1.bf16.msra.mxu0 %v3043_v10  ;;  %1612 = vmatpush1.bf16.msra.mxu1 %v3049_v25 }
 0x577   :  { %1570 = vmatprep.subr.bf16.mxu0 %v3055_v26  ;;  %1613 = vmatprep.subr.bf16.mxu1 %v3061_v27 }
 0x57a   :  { %1571 = vmatpush1.bf16.msra.mxu0 %v3067_v28  ;;  %1614 = vmatpush1.bf16.msra.mxu1 %v3073_v29 }
 0x57b   :  { %1572 = vmatprep.subr.bf16.mxu0 %v3079_v30  ;;  %1615 = vmatprep.subr.bf16.mxu1 %v3085_v31 }
 0x57e   :  { %1573 = vmatpush1.bf16.msra.mxu0 %v3091_v33  ;;  %1616 = vmatpush1.bf16.msra.mxu1 %v3162_v53 }
 0x57f   :  { %1574 = vmatprep.subr.bf16.mxu0 %v3098_v47  ;;  %1617 = vmatprep.subr.bf16.mxu1 %v3169_v43 }
 0x582   :  { %1575 = vmatpush1.bf16.msra.mxu0 %v3105_v44  ;;  %1618 = vmatpush1.bf16.msra.mxu1 %v3176_v46 }
 0x583   :  { %1576 = vmatprep.subr.bf16.mxu0 %v3182_v50  ;;  %1619 = vmatprep.subr.bf16.mxu1 %v3188_v11 }
 0x586   :  { %1577 = vmatpush1.bf16.msra.mxu0 %v3194_v32  ;;  %1620 = vmatpush1.bf16.msra.mxu1 %v3200_v55 }
 0x587   :  { %1714 = vmatprep.subr.bf16.mxu0 %v2946_v7  ;;  %1757 = vmatprep.subr.bf16.mxu1 %v3117_v34 }
 0x63c   :  { %v1444_v49 = vpop.f32.mrb[20].mxu0  ;;  %v1487_v19 = vpop.f32.mrb[20].mxu1 }
 0x63d   :  { %v1996_v57 = vadd.f32 %v1444_v49, %v2789_v51  ;;  %v1446_v8 = vpop.f32.mrb[21].mxu0  ;;  %v1489_v9 = vpop.f32.mrb[21].mxu1  ;;  %v2028_v60 = vadd.f32 %v1487_v19, %v2799_v40 }
 0x63e   :  { %v1997_v12 = vadd.f32 %v1446_v8, %v2791_v52  ;;  %v1448_v36 = vpop.f32.mrb[22].mxu0  ;;  %v1491_v58 = vpop.f32.mrb[22].mxu1  ;;  %v2029_v59 = vadd.f32 %v1489_v9, %v2796_v5 }
 0x63f   :  { %v1958_v38 = vmul.f32 -1.442695, %v1996_v57  ;;  %v1998_v35 = vadd.f32 %v1448_v36, %v2789_v51  ;;  %v1450_v56 = vpop.f32.mrb[23].mxu0  ;;  %v1493_v39 = vpop.f32.mrb[23].mxu1  ;;  %v2030_v0 = vadd.f32 %v1491_v58, %v2799_v40 }
 0x640   :  { %v1960_v37 = vmul.f32 -1.442695, %v1997_v12  ;;  %v1999_v7 = vadd.f32 %v1450_v56, %v2791_v52  ;;  %v1962_v61 = vmul.f32 -1.442695, %v2029_v59  ;;  %v2031_v62 = vadd.f32 %v1493_v39, %v2796_v5 }
 0x641   :  { %2328 = vpow2.f32 %v1958_v38  ;;  %v1959_v34 = vmul.f32 -1.442695, %v1998_v35 }
 0x642   :  { %2330 = vpow2.f32 %v1960_v37  ;;  %v1961_v54 = vmul.f32 -1.442695, %v1999_v7  ;;  %v1963_v4 = vmul.f32 -1.442695, %v2031_v62 }
 0x643   :  { %2332 = vpow2.f32 %v1959_v34 }
 0x644   :  { %2334 = vpow2.f32 %v1961_v54 }
 0x645   :  { %2336 = vtanh.f32 %v2028_v60 }
 0x646   :  { %2338 = vpow2.f32 %v1962_v61 }
 0x647   :  { %2340 = vtanh.f32 %v2030_v0 }
 0x64b   :  { %v2329_v2 = vpop.eup %2328 }
 0x64c   :  { %v2331_v45 = vpop.eup %2330  ;;  %v1510_v3 = vadd.f32 1.0, %v2329_v2 }
 0x64d   :  { %v1522_v6 = vadd.f32 1.0, %v2331_v45  ;;  %v2333_v42 = vpop.eup %2332 }
 0x64e   :  { %2342 = vrcp.f32 %v1510_v3  ;;  %v1511_v49 = vadd.f32 1.0, %v2333_v42  ;;  %v2335_v57 = vpop.eup %2334 }
 0x64f   :  { %2344 = vrcp.f32 %v1522_v6  ;;  %v1523_v19 = vadd.f32 1.0, %v2335_v57  ;;  %v2337_v8 = vpop.eup %2336 }
 0x650   :  { %2346 = vpow2.f32 %v1963_v4  ;;  %v2339_v9 = vpop.eup %2338 }
 0x651   :  { %2348 = vrcp.f32 %v1511_v49  ;;  %v2341_v12 = vpop.eup %2340  ;;  %v1536_v37 = vadd.f32 1.0, %v2339_v9 }
 0x652   :  { %2350 = vrcp.f32 %v1523_v19 }
 0x653   :  { %2352 = vrcp.f32 %v1536_v37 }
 0x658   :  { %v2343_v36 = vpop.eup %2342 }
 0x659   :  { %v2345_v58 = vpop.eup %2344  ;;  %v1544_v38 = vmul.f32 %v2343_v36, %v2337_v8 }
 0x65a   :  { %v2347_v35 = vpop.eup %2346  ;;  %v1542_v56 = vmul.f32 %v2345_v58, %v3129_v41 }
 0x65b   :  { %v2349_v39 = vpop.eup %2348  ;;  %v1537_v59 = vadd.f32 1.0, %v2347_v35 }
 0x65c   :  { %v3214_v7 = vadd.f32 %v1544_v38, %v1542_v56  ;;  %v1545_v34 = vmul.f32 %v2349_v39, %v2341_v12  ;;  %v2351_v54 = vpop.eup %2350 }
 0x65d   :  { %v1543_v60 = vmul.f32 %v2351_v54, %v3133_v63  ;;  %v2353_v62 = vpop.eup %2352 }
 0x65e   :  { %2354 = vtanh.f32 %v3214_v7 }
 0x65f   :  { %v3218_v61 = vadd.f32 %v1545_v34, %v1543_v60  ;;  %2356 = vrcp.f32 %v1537_v59 }
 0x661   :  { %2358 = vtanh.f32 %v3218_v61 }
 0x668   :  { %v2355_v0 = vpop.eup %2354 }
 0x669   :  { %v2357_v41 = vpop.eup %2356  ;;  %v1550_v45 = vmul.f32 %v2355_v0, %v2353_v62 }
 0x66b   :  { %v2359_v2 = vpop.eup %2358 }
 0x66c   :  { %v1551_v3 = vmul.f32 %v2359_v2, %v2357_v41 }
 0x66e   :  { %v1561_v4 = vpack.c.bf16 %v1551_v3, %v1550_v45 }
 0x670   :  { %1595 = vmatmul.mubr.bf16.vlgmr.msra.gmra.mrb[24].mxu0 %v1561_v4  ;;  %1638 = vmatmul.mubr.bf16.vlgmr.msra.gmra.mrb[24].mxu1 %v1561_v4 }
 0x671   :  { %1715 = vmatpush1.bf16.msra.mxu0 %v2969_v48  ;;  %1758 = vmatpush1.bf16.msra.mxu1 %v2975_v13 }
 0x672   :  { %1716 = vmatprep.subr.bf16.mxu0 %v2981_v14  ;;  %1759 = vmatprep.subr.bf16.mxu1 %v2987_v15 }
 0x673   :  { %1746 = vmatprep.mubr.bf16.mxu0 %v2456_v1  ;;  %1789 = vmatprep.mubr.bf16.mxu1 %v2456_v1 }
 0x675   :  { %1717 = vmatpush1.bf16.msra.mxu0 %v2995_v16  ;;  %1760 = vmatpush1.bf16.msra.mxu1 %v3001_v17 }
 0x676   :  { %1718 = vmatprep.subr.bf16.mxu0 %v3007_v18  ;;  %1761 = vmatprep.subr.bf16.mxu1 %v3013_v20 }
 0x679   :  { %1719 = vmatpush1.bf16.msra.mxu0 %v3019_v21  ;;  %1762 = vmatpush1.bf16.msra.mxu1 %v3025_v22 }
 0x67a   :  { %1720 = vmatprep.subr.bf16.mxu0 %v3031_v23  ;;  %1763 = vmatprep.subr.bf16.mxu1 %v3037_v24 }
 0x67d   :  { %1721 = vmatpush1.bf16.msra.mxu0 %v3043_v10  ;;  %1764 = vmatpush1.bf16.msra.mxu1 %v3049_v25 }
 0x67e   :  { %1722 = vmatprep.subr.bf16.mxu0 %v3055_v26  ;;  %1765 = vmatprep.subr.bf16.mxu1 %v3061_v27 }
 0x681   :  { %1723 = vmatpush1.bf16.msra.mxu0 %v3067_v28  ;;  %1766 = vmatpush1.bf16.msra.mxu1 %v3073_v29 }
 0x682   :  { %1724 = vmatprep.subr.bf16.mxu0 %v3079_v30  ;;  %1767 = vmatprep.subr.bf16.mxu1 %v3085_v31 }
 0x685   :  { %1725 = vmatpush1.bf16.msra.mxu0 %v3091_v33  ;;  %1768 = vmatpush1.bf16.msra.mxu1 %v3162_v53 }
 0x686   :  { %1726 = vmatprep.subr.bf16.mxu0 %v3098_v47  ;;  %1769 = vmatprep.subr.bf16.mxu1 %v3169_v43 }
 0x689   :  { %1727 = vmatpush1.bf16.msra.mxu0 %v3105_v44  ;;  %1770 = vmatpush1.bf16.msra.mxu1 %v3176_v46 }
 0x68a   :  { %1728 = vmatprep.subr.bf16.mxu0 %v3182_v50  ;;  %1771 = vmatprep.subr.bf16.mxu1 %v3188_v11 }
 0x68d   :  { %1729 = vmatpush1.bf16.msra.mxu0 %v3194_v32  ;;  %1772 = vmatpush1.bf16.msra.mxu1 %v3200_v55 }
 0x743   :  { %v1596_v1 = vpop.f32.mrb[24].mxu0  ;;  %v1639_v48 = vpop.f32.mrb[24].mxu1 }
 0x744   :  { %v2000_v13 = vadd.f32 %v1596_v1, %v2789_v51  ;;  %v1598_v14 = vpop.f32.mrb[25].mxu0  ;;  %v1641_v15 = vpop.f32.mrb[25].mxu1  ;;  %v2032_v28 = vadd.f32 %v1639_v48, %v2799_v40 }
 0x745   :  { %v2001_v16 = vadd.f32 %v1598_v14, %v2791_v52  ;;  %v1600_v17 = vpop.f32.mrb[26].mxu0  ;;  %v1643_v18 = vpop.f32.mrb[26].mxu1  ;;  %v2033_v27 = vadd.f32 %v1641_v15, %v2796_v5 }
 0x746   :  { %v1964_v20 = vmul.f32 -1.442695, %v2000_v13  ;;  %v2002_v21 = vadd.f32 %v1600_v17, %v2789_v51  ;;  %v1602_v22 = vpop.f32.mrb[27].mxu0  ;;  %v1645_v23 = vpop.f32.mrb[27].mxu1  ;;  %v2034_v31 = vadd.f32 %v1643_v18, %v2799_v40 }
 0x747   :  { %v1966_v24 = vmul.f32 -1.442695, %v2001_v16  ;;  %v2003_v10 = vadd.f32 %v1602_v22, %v2791_v52  ;;  %v1968_v29 = vmul.f32 -1.442695, %v2033_v27  ;;  %v2035_v30 = vadd.f32 %v1645_v23, %v2796_v5 }
 0x748   :  { %2360 = vpow2.f32 %v1964_v20  ;;  %v1965_v25 = vmul.f32 -1.442695, %v2002_v21 }
 0x749   :  { %2362 = vpow2.f32 %v1966_v24  ;;  %v1967_v26 = vmul.f32 -1.442695, %v2003_v10  ;;  %v1969_v63 = vmul.f32 -1.442695, %v2035_v30 }
 0x74a   :  { %2364 = vpow2.f32 %v1965_v25 }
 0x74b   :  { %2366 = vpow2.f32 %v1967_v26 }
 0x74c   :  { %2368 = vtanh.f32 %v2032_v28 }
 0x74d   :  { %2370 = vpow2.f32 %v1968_v29 }
 0x74e   :  { %2372 = vtanh.f32 %v2034_v31 }
 0x752   :  { %v2361_v33 = vpop.eup %2360 }
 0x753   :  { %v2363_v47 = vpop.eup %2362  ;;  %v1662_v44 = vadd.f32 1.0, %v2361_v33 }
 0x754   :  { %v1674_v53 = vadd.f32 1.0, %v2363_v47  ;;  %v2365_v43 = vpop.eup %2364 }
 0x755   :  { %2374 = vrcp.f32 %v1662_v44  ;;  %v1663_v46 = vadd.f32 1.0, %v2365_v43  ;;  %v2367_v50 = vpop.eup %2366 }
 0x756   :  { %2376 = vrcp.f32 %v1674_v53  ;;  %v1675_v11 = vadd.f32 1.0, %v2367_v50  ;;  %v2369_v32 = vpop.eup %2368 }
 0x757   :  { %2378 = vpow2.f32 %v1969_v63  ;;  %v2371_v55 = vpop.eup %2370 }
 0x758   :  { %2380 = vrcp.f32 %v1663_v46  ;;  %v2373_v6 = vpop.eup %2372  ;;  %v1688_v12 = vadd.f32 1.0, %v2371_v55 }
 0x759   :  { %2382 = vrcp.f32 %v1675_v11 }
 0x75a   :  { %2384 = vrcp.f32 %v1688_v12 }
 0x75f   :  { %v2375_v42 = vpop.eup %2374 }
 0x760   :  { %v2377_v49 = vpop.eup %2376  ;;  %v1696_v57 = vmul.f32 %v2375_v42, %v2369_v32 }
 0x761   :  { %v2379_v19 = vpop.eup %2378  ;;  %v1694_v8 = vmul.f32 %v2377_v49, %v3214_v7 }
 0x762   :  { %v2381_v9 = vpop.eup %2380  ;;  %v1689_v35 = vadd.f32 1.0, %v2379_v19 }
 0x763   :  { %v3262_v36 = vadd.f32 %v1696_v57, %v1694_v8  ;;  %v1697_v58 = vmul.f32 %v2381_v9, %v2373_v6  ;;  %v2383_v38 = vpop.eup %2382 }
 0x764   :  { %v1695_v56 = vmul.f32 %v2383_v38, %v3218_v61  ;;  %v2385_v37 = vpop.eup %2384 }
 0x765   :  { %2386 = vtanh.f32 %v3262_v36 }
 0x766   :  { %v3266_v39 = vadd.f32 %v1697_v58, %v1695_v56  ;;  %2388 = vrcp.f32 %v1689_v35 }
 0x768   :  { %2390 = vtanh.f32 %v3266_v39 }
 0x76f   :  { %v2387_v34 = vpop.eup %2386 }
 0x770   :  { %v2389_v7 = vpop.eup %2388  ;;  %v1702_v59 = vmul.f32 %v2387_v34, %v2385_v37 }
 0x772   :  { %v2391_v54 = vpop.eup %2390 }
 0x773   :  { %v1703_v60 = vmul.f32 %v2391_v54, %v2389_v7 }
 0x775   :  { %v1713_v62 = vpack.c.bf16 %v1703_v60, %v1702_v59 }
 0x777   :  { %1747 = vmatmul.mubr.bf16.vlgmr.msra.gmra.mrb[28].mxu0 %v1713_v62  ;;  %1790 = vmatmul.mubr.bf16.vlgmr.msra.gmra.mrb[28].mxu1 %v1713_v62 }
 0x84a   :  { %v1748_v0 = vpop.f32.mrb[28].mxu0  ;;  %v1791_v41 = vpop.f32.mrb[28].mxu1 }
 0x84b   :  { %v2004_v61 = vadd.f32 %v1748_v0, %v2789_v51  ;;  %v1750_v2 = vpop.f32.mrb[29].mxu0  ;;  %v1793_v45 = vpop.f32.mrb[29].mxu1  ;;  %v2036_v22 = vadd.f32 %v1791_v41, %v2799_v40 }
 0x84c   :  { %v2005_v3 = vadd.f32 %v1750_v2, %v2791_v52  ;;  %v1752_v4 = vpop.f32.mrb[30].mxu0  ;;  %v1795_v1 = vpop.f32.mrb[30].mxu1  ;;  %v2037_v21 = vadd.f32 %v1793_v45, %v2796_v5 }
 0x84d   :  { %v1970_v48 = vmul.f32 -1.442695, %v2004_v61  ;;  %v2006_v13 = vadd.f32 %v1752_v4, %v2789_v51  ;;  %v1754_v14 = vpop.f32.mrb[31].mxu0  ;;  %v1797_v15 = vpop.f32.mrb[31].mxu1  ;;  %v2038_v51 = vadd.f32 %v1795_v1, %v2799_v40 }
 0x84e   :  { %v1972_v16 = vmul.f32 -1.442695, %v2005_v3  ;;  %v2007_v17 = vadd.f32 %v1754_v14, %v2791_v52  ;;  %v1974_v23 = vmul.f32 -1.442695, %v2037_v21  ;;  %v2039_v24 = vadd.f32 %v1797_v15, %v2796_v5 }
 0x84f   :  { %2392 = vpow2.f32 %v1970_v48  ;;  %v1971_v18 = vmul.f32 -1.442695, %v2006_v13 }
 0x850   :  { %2394 = vpow2.f32 %v1972_v16  ;;  %v1973_v20 = vmul.f32 -1.442695, %v2007_v17  ;;  %v1975_v52 = vmul.f32 -1.442695, %v2039_v24 }
 0x851   :  { %2396 = vpow2.f32 %v1971_v18 }
 0x852   :  { %2398 = vpow2.f32 %v1973_v20 }
 0x853   :  { %2400 = vtanh.f32 %v2036_v22 }
 0x854   :  { %2402 = vpow2.f32 %v1974_v23 }
 0x855   :  { %2404 = vtanh.f32 %v2038_v51 }
 0x859   :  { %v2393_v10 = vpop.eup %2392 }
 0x85a   :  { %v2395_v25 = vpop.eup %2394  ;;  %v1814_v26 = vadd.f32 1.0, %v2393_v10 }
 0x85b   :  { %v1826_v27 = vadd.f32 1.0, %v2395_v25  ;;  %v2397_v28 = vpop.eup %2396 }
 0x85c   :  { %2406 = vrcp.f32 %v1814_v26  ;;  %v1815_v29 = vadd.f32 1.0, %v2397_v28  ;;  %v2399_v30 = vpop.eup %2398 }
 0x85d   :  { %2408 = vrcp.f32 %v1826_v27  ;;  %v1827_v31 = vadd.f32 1.0, %v2399_v30  ;;  %v2401_v5 = vpop.eup %2400 }
 0x85e   :  { %2410 = vpow2.f32 %v1975_v52  ;;  %v2403_v33 = vpop.eup %2402 }
 0x85f   :  { %2412 = vrcp.f32 %v1815_v29  ;;  %v2405_v40 = vpop.eup %2404  ;;  %v1840_v53 = vadd.f32 1.0, %v2403_v33 }
 0x860   :  { %2414 = vrcp.f32 %v1827_v31 }
 0x861   :  { %2416 = vrcp.f32 %v1840_v53 }
 0x866   :  { %v2407_v47 = vpop.eup %2406 }
 0x867   :  { %v2409_v44 = vpop.eup %2408  ;;  %v1848_v63 = vmul.f32 %v2407_v47, %v2401_v5 }
 0x868   :  { %v2411_v43 = vpop.eup %2410  ;;  %v1846_v46 = vmul.f32 %v2409_v44, %v3262_v36 }
 0x869   :  { %v2413_v50 = vpop.eup %2412  ;;  %v1841_v6 = vadd.f32 1.0, %v2411_v43 }
 0x86a   :  { %v1850_v11 = vadd.f32 %v1848_v63, %v1846_v46  ;;  %v1849_v32 = vmul.f32 %v2413_v50, %v2405_v40  ;;  %v2415_v55 = vpop.eup %2414 }
 0x86b   :  { %v1847_v42 = vmul.f32 %v2415_v55, %v3266_v39  ;;  %v2417_v57 = vpop.eup %2416 }
 0x86c   :  { %2418 = vtanh.f32 %v1850_v11  ;;  %1858 = vst [vmem:[%s3295_s5] sm:$0xff] %v1850_v11 }
 0x86d   :  { %v1851_v49 = vadd.f32 %v1849_v32, %v1847_v42  ;;  %2420 = vrcp.f32 %v1841_v6 }
 0x86f   :  { %2422 = vtanh.f32 %v1851_v49  ;;  %1859 = vst [vmem:[%s3295_s5 + $0x8] sm:$0xff] %v1851_v49 }
 0x876   :  { %v2419_v19 = vpop.eup %2418 }
 0x877   :  { %v1854_v8 = vmul.f32 %v2419_v19, %v2417_v57  ;;  %v2421_v9 = vpop.eup %2420 }
 0x879   :  { %1856 = vst [vmem:[%s3296_s4] sm:$0xff] %v1854_v8  ;;  %v2423_v12 = vpop.eup %2422 }
 0x87a   :  { %v1855_v36 = vmul.f32 %v2423_v12, %v2421_v9 }
 0x87c   :  { %1857 = vst [vmem:[%s3296_s4 + $0x8] sm:$0xff] %v1855_v36 }

</bundles_post_ra>
